<compile_context>
chip_gen: v7x
topology: tpu7x:2x2x1
jax: 0.10.0
libtpu: 0.0.40
codegen_flags: <defaults>
</compile_context>

<pallas_src>
import numpy as np
import jax
import jax.numpy as jnp
from jax.experimental import pallas as pl
from jax.experimental.pallas import tpu as pltpu

# small, module-consistent sizes (module defaults 512/8/64/2048 scaled down)
B = 2        # batch
S = 8        # sequence length
DMODEL = 32  # d_model
H = 4        # heads
DK = 8       # per-head key dim
DV = 8       # per-head value dim
DFF = 64     # feed-forward hidden
EPS = 1e-5   # torch LayerNorm default eps
NEG_INF = -1e30


# ---------------- fused decoder-block kernel (whole batch in one invocation) ----------------
def _decoder_block_kernel(x_enc_ref, x_dec_ref,
                          wq_m_ref, wk_m_ref, wv_m_ref, wo_m_ref,
                          wq_c_ref, wk_c_ref, wv_c_ref, wo_c_ref,
                          w1_ref, b1_ref, w2_ref, b2_ref,
                          o_ref):
    N = B * S
    x_enc = x_enc_ref[...]            # (B, S, D)
    x_dec = x_dec_ref[...]            # (B, S, D)

    def layernorm(x):                 # (B, S, D) -> (N, D); torch LayerNorm over dims (1, 2)
        mean = jnp.mean(jnp.mean(x, axis=2, keepdims=True), axis=1, keepdims=True)
        cent = x - mean
        var = jnp.mean(jnp.mean(cent * cent, axis=2, keepdims=True), axis=1, keepdims=True)
        return (cent * jax.lax.rsqrt(var + EPS)).reshape(N, DMODEL)

    # causal additive bias built in-kernel (finite large-negative instead of -inf)
    row = jax.lax.broadcasted_iota(jnp.int32, (S, S), 0)
    col = jax.lax.broadcasted_iota(jnp.int32, (S, S), 1)
    causal_bias = jnp.where(col > row, jnp.float32(NEG_INF), jnp.float32(0.0))

    def mha(xq, xkv, wq_ref, wk_ref, wv_ref, wo_ref, bias):
        # xq, xkv: (N, D) flattened rows.  1/sqrt(dk) already folded into wq.
        out = jnp.zeros((N, DMODEL), jnp.float32)
        for i in range(H):            # static unroll; weights sliced on the leading dim (free)
            q = jnp.dot(xq, wq_ref[i], preferred_element_type=jnp.float32).reshape(B, S, DK)
            k = jnp.dot(xkv, wk_ref[i], preferred_element_type=jnp.float32).reshape(B, S, DK)
            v = jnp.dot(xkv, wv_ref[i], preferred_element_type=jnp.float32).reshape(B, S, DV)
            s = jnp.einsum('bqe,bke->bqk', q, k, preferred_element_type=jnp.float32)
            if bias is not None:
                s = s + bias[None]
            s = s - jnp.max(s, axis=-1, keepdims=True)
            e = jnp.exp(s)
            p = e * pl.reciprocal(jnp.sum(e, axis=-1, keepdims=True), approx=False)
            ctx = jnp.einsum('bqk,bke->bqe', p, v, preferred_element_type=jnp.float32)
            # accumulate this head straight through its sublane-aligned Wo slice
            # (no VMEM scratch, no masked lane-offset stores)
            out = out + jnp.dot(ctx.reshape(N, DV), wo_ref[i * DV:(i + 1) * DV, :],
                                preferred_element_type=jnp.float32)
        return out

    # masked self-attention + residual (dropout == identity, eval)
    x_dec_flat = x_dec.reshape(N, DMODEL)
    x_dec_n = layernorm(x_dec)
    current = x_dec_flat + mha(x_dec_n, x_dec_n,
                               wq_m_ref, wk_m_ref, wv_m_ref, wo_m_ref, causal_bias)

    # cross-attention over encoder output + residual
    current_n = layernorm(current.reshape(B, S, DMODEL))
    x_enc_n = layernorm(x_enc)
    result = current + mha(current_n, x_enc_n,
                           wq_c_ref, wk_c_ref, wv_c_ref, wo_c_ref, None)

    # feed-forward + residual
    result_n = layernorm(result.reshape(B, S, DMODEL))
    hdn = jnp.dot(result_n, w1_ref[...], preferred_element_type=jnp.float32) + b1_ref[...]
    hdn = jnp.maximum(hdn, 0.0)
    ff = jnp.dot(hdn, w2_ref[...], preferred_element_type=jnp.float32) + b2_ref[...]
    o_ref[...] = result + ff


def decoder_block(x_enc, x_dec, packed):
    """packed = (wq_m, wk_m, wv_m, wo_m, wq_c, wk_c, wv_c, wo_c, w1, b1, w2, b2)."""
    flat = pl.pallas_call(
        _decoder_block_kernel,
        out_shape=jax.ShapeDtypeStruct((B * S, DMODEL), jnp.float32),
        in_specs=[pl.BlockSpec(memory_space=pltpu.MemorySpace.VMEM)] * (2 + len(packed)),
        out_specs=pl.BlockSpec(memory_space=pltpu.MemorySpace.VMEM),
        compiler_params=pltpu.CompilerParams(vmem_limit_bytes=32 * 1024 * 1024),
    )(x_enc, x_dec, *packed)
    # wrapper-side reshape is free layout plumbing
    return flat.reshape(B, S, DMODEL)


# ---------------- one-time weight packing (head-major weights, scale folded into Wq) --------
def pack_params(params):
    def pack_mha(p):
        scale = jnp.float32(1.0 / np.sqrt(DK))
        return (p["wq"] * scale,   # (H, DMODEL, DK), head-major, 1/sqrt(dk) folded in
                p["wk"],           # (H, DMODEL, DK)
                p["wv"],           # (H, DMODEL, DV)
                p["wo"])           # (H*DV, DMODEL)

    m = pack_mha(params["masked_mha"])
    c = pack_mha(params["cross_mha"])
    f = params["ffn"]
    return (*m, *c, f["w1"], f["b1"], f["w2"], f["b2"])


# ---------------- deterministic parameter init (torch-like per-head layout) ----------------
def init_params(key):
    def nrm(k, shape, scale=0.05):
        return (scale * jax.random.normal(k, shape)).astype(jnp.float32)

    keys = jax.random.split(key, 12)
    mha_masked = dict(wq=nrm(keys[0], (H, DMODEL, DK)),
                      wk=nrm(keys[1], (H, DMODEL, DK)),
                      wv=nrm(keys[2], (H, DMODEL, DV)),
                      wo=nrm(keys[3], (H * DV, DMODEL)))
    mha_cross = dict(wq=nrm(keys[4], (H, DMODEL, DK)),
                     wk=nrm(keys[5], (H, DMODEL, DK)),
                     wv=nrm(keys[6], (H, DMODEL, DV)),
                     wo=nrm(keys[7], (H * DV, DMODEL)))
    ffn = dict(w1=nrm(keys[8], (DMODEL, DFF)),
               b1=nrm(keys[9], (1, DFF)),
               w2=nrm(keys[10], (DFF, DMODEL)),
               b2=nrm(keys[11], (1, DMODEL)))
    return dict(masked_mha=mha_masked, cross_mha=mha_cross, ffn=ffn)


# ---------------- pure-JAX reference (mirrors the PyTorch module) ----------------
def _ref_layernorm(x):
    mean = jnp.mean(x, axis=(1, 2), keepdims=True)
    var = jnp.mean((x - mean) ** 2, axis=(1, 2), keepdims=True)
    return (x - mean) / jnp.sqrt(var + EPS)


def _ref_mha(x_q, x_kv, p, has_mask):
    heads = []
    for i in range(H):
        q = x_q @ p["wq"][i]
        k = x_kv @ p["wk"][i]
        v = x_kv @ p["wv"][i]
        w = (q @ jnp.swapaxes(k, 1, 2)) / np.sqrt(DK)
        if has_mask:
            row = jax.lax.broadcasted_iota(jnp.int32, (S, S), 0)
            col = jax.lax.broadcasted_iota(jnp.int32, (S, S), 1)
            w = w + jnp.where(col > row, -jnp.inf, 0.0)[None]
        w = jax.nn.softmax(w, axis=2)
        heads.append(w @ v)
    return jnp.concatenate(heads, axis=2) @ p["wo"]


def _ref_decoder_block(x_enc, x_dec, params):
    x_dn = _ref_layernorm(x_dec)
    cur = x_dec + _ref_mha(x_dn, x_dn, params["masked_mha"], True)
    cur_n = _ref_layernorm(cur)
    enc_n = _ref_layernorm(x_enc)
    res = cur + _ref_mha(cur_n, enc_n, params["cross_mha"], False)
    res_n = _ref_layernorm(res)
    p = params["ffn"]
    ff = jnp.maximum(res_n @ p["w1"] + p["b1"], 0.0) @ p["w2"] + p["b2"]
    return res + ff


if __name__ == "__main__":
    key = jax.random.PRNGKey(0)
    k_enc, k_dec, k_params = jax.random.split(key, 3)
    x_enc = jax.random.normal(k_enc, (B, S, DMODEL), dtype=jnp.float32)
    x_dec = jax.random.normal(k_dec, (B, S, DMODEL), dtype=jnp.float32)
    params = init_params(k_params)
    packed = pack_params(params)          # one-time layout plumbing

    out = decoder_block(x_enc, x_dec, packed)
    out = jax.block_until_ready(out)

    ref = _ref_decoder_block(x_enc, x_dec, params)
    assert out.shape == (B, S, DMODEL) and out.dtype == jnp.float32
    np.testing.assert_allclose(np.asarray(out), np.asarray(ref), rtol=2e-3, atol=2e-3)

    print("KERNEL_OK")
</pallas_src>

<mosaic_0001>
module attributes {stable_mosaic.version = 11 : i64} {
  func.func @_decoder_block_kernel(%arg0: memref<2x8x32xf32, #tpu.memory_space<vmem>>, %arg1: memref<2x8x32xf32, #tpu.memory_space<vmem>>, %arg2: memref<4x32x8xf32, #tpu.memory_space<vmem>>, %arg3: memref<4x32x8xf32, #tpu.memory_space<vmem>>, %arg4: memref<4x32x8xf32, #tpu.memory_space<vmem>>, %arg5: memref<32x32xf32, #tpu.memory_space<vmem>>, %arg6: memref<4x32x8xf32, #tpu.memory_space<vmem>>, %arg7: memref<4x32x8xf32, #tpu.memory_space<vmem>>, %arg8: memref<4x32x8xf32, #tpu.memory_space<vmem>>, %arg9: memref<32x32xf32, #tpu.memory_space<vmem>>, %arg10: memref<32x64xf32, #tpu.memory_space<vmem>>, %arg11: memref<1x64xf32, #tpu.memory_space<vmem>>, %arg12: memref<64x32xf32, #tpu.memory_space<vmem>>, %arg13: memref<1x32xf32, #tpu.memory_space<vmem>>, %arg14: memref<16x32xf32, #tpu.memory_space<vmem>>) attributes {dimension_semantics = [], scalar_prefetch = 0 : i64, scratch_operands = 0 : i64, tpu.core_type = #tpu.core_type<tc>} {
    %c0 = arith.constant 0 : index
    %c0_0 = arith.constant 0 : index
    %c0_1 = arith.constant 0 : index
    %0 = vector.load %arg0[%c0, %c0_0, %c0_1] : memref<2x8x32xf32, #tpu.memory_space<vmem>>, vector<2x8x32xf32>
    %c0_2 = arith.constant 0 : index
    %c0_3 = arith.constant 0 : index
    %c0_4 = arith.constant 0 : index
    %1 = vector.load %arg1[%c0_2, %c0_3, %c0_4] : memref<2x8x32xf32, #tpu.memory_space<vmem>>, vector<2x8x32xf32>
    %2 = tpu.iota {dimensions = array<i32: 0>} : vector<8x8xi32>
    %3 = tpu.iota {dimensions = array<i32: 1>} : vector<8x8xi32>
    %4 = arith.cmpi sgt, %3, %2 : vector<8x8xi32>
    %cst = arith.constant -1.000000e+30 : f32
    %cst_5 = arith.constant 0.000000e+00 : f32
    %5 = vector.broadcast %cst : f32 to vector<8x8xf32>
    %6 = vector.broadcast %cst_5 : f32 to vector<8x8xf32>
    %7 = arith.select %4, %5, %6 : vector<8x8xi1>, vector<8x8xf32>
    %8 = vector.shape_cast %1 : vector<2x8x32xf32> to vector<16x32xf32>
    %cst_6 = arith.constant dense<0.000000e+00> : vector<2x8xf32>
    %9 = vector.multi_reduction <add>, %1, %cst_6 [2] : vector<2x8x32xf32> to vector<2x8xf32>
    %10 = vector.shape_cast %9 : vector<2x8xf32> to vector<2x8x1xf32>
    %cst_7 = arith.constant 3.200000e+01 : f32
    %11 = vector.broadcast %cst_7 : f32 to vector<2x8x1xf32>
    %12 = arith.divf %10, %11 : vector<2x8x1xf32>
    %cst_8 = arith.constant dense<0.000000e+00> : vector<2x1xf32>
    %13 = vector.multi_reduction <add>, %12, %cst_8 [1] : vector<2x8x1xf32> to vector<2x1xf32>
    %14 = vector.shape_cast %13 : vector<2x1xf32> to vector<2x1x1xf32>
    %cst_9 = arith.constant 8.000000e+00 : f32
    %15 = vector.broadcast %cst_9 : f32 to vector<2x1x1xf32>
    %16 = arith.divf %14, %15 : vector<2x1x1xf32>
    %17 = vector.broadcast %16 : vector<2x1x1xf32> to vector<2x8x32xf32>
    %18 = arith.subf %1, %17 : vector<2x8x32xf32>
    %19 = arith.mulf %18, %18 : vector<2x8x32xf32>
    %cst_10 = arith.constant dense<0.000000e+00> : vector<2x8xf32>
    %20 = vector.multi_reduction <add>, %19, %cst_10 [2] : vector<2x8x32xf32> to vector<2x8xf32>
    %21 = vector.shape_cast %20 : vector<2x8xf32> to vector<2x8x1xf32>
    %cst_11 = arith.constant 3.200000e+01 : f32
    %22 = vector.broadcast %cst_11 : f32 to vector<2x8x1xf32>
    %23 = arith.divf %21, %22 : vector<2x8x1xf32>
    %cst_12 = arith.constant dense<0.000000e+00> : vector<2x1xf32>
    %24 = vector.multi_reduction <add>, %23, %cst_12 [1] : vector<2x8x1xf32> to vector<2x1xf32>
    %25 = vector.shape_cast %24 : vector<2x1xf32> to vector<2x1x1xf32>
    %cst_13 = arith.constant 8.000000e+00 : f32
    %26 = vector.broadcast %cst_13 : f32 to vector<2x1x1xf32>
    %27 = arith.divf %25, %26 : vector<2x1x1xf32>
    %cst_14 = arith.constant 9.99999974E-6 : f32
    %28 = vector.broadcast %cst_14 : f32 to vector<2x1x1xf32>
    %29 = arith.addf %27, %28 : vector<2x1x1xf32>
    %30 = math.rsqrt %29 : vector<2x1x1xf32>
    %31 = vector.broadcast %30 : vector<2x1x1xf32> to vector<2x8x32xf32>
    %32 = arith.mulf %18, %31 : vector<2x8x32xf32>
    %33 = vector.shape_cast %32 : vector<2x8x32xf32> to vector<16x32xf32>
    %cst_15 = arith.constant 0.000000e+00 : f32
    %34 = vector.broadcast %cst_15 : f32 to vector<16x32xf32>
    %c0_16 = arith.constant 0 : index
    %c0_17 = arith.constant 0 : index
    %c0_18 = arith.constant 0 : index
    %35 = vector.load %arg2[%c0_16, %c0_17, %c0_18] : memref<4x32x8xf32, #tpu.memory_space<vmem>>, vector<1x32x8xf32>
    %36 = vector.shape_cast %35 : vector<1x32x8xf32> to vector<32x8xf32>
    %cst_19 = arith.constant dense<0.000000e+00> : vector<16x8xf32>
    %37 = tpu.matmul %33, %36, %cst_19 {dimension_numbers = #tpu.dot_dimension_numbers<[1], [0], [0], [1], [0, 0, 1, 1], [], []>} : vector<16x32xf32>, vector<32x8xf32>, vector<16x8xf32> -> vector<16x8xf32>
    %38 = vector.shape_cast %37 : vector<16x8xf32> to vector<2x8x8xf32>
    %c0_20 = arith.constant 0 : index
    %c0_21 = arith.constant 0 : index
    %c0_22 = arith.constant 0 : index
    %39 = vector.load %arg3[%c0_20, %c0_21, %c0_22] : memref<4x32x8xf32, #tpu.memory_space<vmem>>, vector<1x32x8xf32>
    %40 = vector.shape_cast %39 : vector<1x32x8xf32> to vector<32x8xf32>
    %cst_23 = arith.constant dense<0.000000e+00> : vector<16x8xf32>
    %41 = tpu.matmul %33, %40, %cst_23 {dimension_numbers = #tpu.dot_dimension_numbers<[1], [0], [0], [1], [0, 0, 1, 1], [], []>} : vector<16x32xf32>, vector<32x8xf32>, vector<16x8xf32> -> vector<16x8xf32>
    %42 = vector.shape_cast %41 : vector<16x8xf32> to vector<2x8x8xf32>
    %c0_24 = arith.constant 0 : index
    %c0_25 = arith.constant 0 : index
    %c0_26 = arith.constant 0 : index
    %43 = vector.load %arg4[%c0_24, %c0_25, %c0_26] : memref<4x32x8xf32, #tpu.memory_space<vmem>>, vector<1x32x8xf32>
    %44 = vector.shape_cast %43 : vector<1x32x8xf32> to vector<32x8xf32>
    %cst_27 = arith.constant dense<0.000000e+00> : vector<16x8xf32>
    %45 = tpu.matmul %33, %44, %cst_27 {dimension_numbers = #tpu.dot_dimension_numbers<[1], [0], [0], [1], [0, 0, 1, 1], [], []>} : vector<16x32xf32>, vector<32x8xf32>, vector<16x8xf32> -> vector<16x8xf32>
    %46 = vector.shape_cast %45 : vector<16x8xf32> to vector<2x8x8xf32>
    "tpu.trace_start"() <{level = 10 : i32, message = "bqe,bke->bqk"}> : () -> ()
    %cst_28 = arith.constant dense<0.000000e+00> : vector<2x8x8xf32>
    %47 = tpu.matmul %38, %42, %cst_28 {dimension_numbers = #tpu.dot_dimension_numbers<[2], [2], [1], [1], [0, 0, 0, 1, 1, 1], [0], [0]>} : vector<2x8x8xf32>, vector<2x8x8xf32>, vector<2x8x8xf32> -> vector<2x8x8xf32>
    "tpu.trace_stop"() : () -> ()
    %48 = vector.shape_cast %7 : vector<8x8xf32> to vector<1x8x8xf32>
    %49 = vector.broadcast %48 : vector<1x8x8xf32> to vector<2x8x8xf32>
    %50 = arith.addf %47, %49 : vector<2x8x8xf32>
    %cst_29 = arith.constant dense<0xFF800000> : vector<2x8xf32>
    %51 = vector.multi_reduction <maximumf>, %50, %cst_29 [2] : vector<2x8x8xf32> to vector<2x8xf32>
    %52 = vector.shape_cast %51 : vector<2x8xf32> to vector<2x8x1xf32>
    %53 = vector.broadcast %52 : vector<2x8x1xf32> to vector<2x8x8xf32>
    %54 = arith.subf %50, %53 : vector<2x8x8xf32>
    %55 = math.exp %54 : vector<2x8x8xf32>
    %cst_30 = arith.constant dense<0.000000e+00> : vector<2x8xf32>
    %56 = vector.multi_reduction <add>, %55, %cst_30 [2] : vector<2x8x8xf32> to vector<2x8xf32>
    %57 = vector.shape_cast %56 : vector<2x8xf32> to vector<2x8x1xf32>
    %58 = tpu.reciprocal %57 : vector<2x8x1xf32> -> vector<2x8x1xf32>
    %59 = vector.broadcast %58 : vector<2x8x1xf32> to vector<2x8x8xf32>
    %60 = arith.mulf %55, %59 : vector<2x8x8xf32>
    "tpu.trace_start"() <{level = 10 : i32, message = "bqk,bke->bqe"}> : () -> ()
    %cst_31 = arith.constant dense<0.000000e+00> : vector<2x8x8xf32>
    %61 = tpu.matmul %60, %46, %cst_31 {dimension_numbers = #tpu.dot_dimension_numbers<[2], [1], [1], [2], [0, 0, 0, 1, 1, 2], [0], [0]>} : vector<2x8x8xf32>, vector<2x8x8xf32>, vector<2x8x8xf32> -> vector<2x8x8xf32>
    "tpu.trace_stop"() : () -> ()
    %62 = vector.shape_cast %61 : vector<2x8x8xf32> to vector<16x8xf32>
    %c0_32 = arith.constant 0 : index
    %c0_33 = arith.constant 0 : index
    %63 = vector.load %arg5[%c0_32, %c0_33] : memref<32x32xf32, #tpu.memory_space<vmem>>, vector<8x32xf32>
    %cst_34 = arith.constant dense<0.000000e+00> : vector<16x32xf32>
    %64 = tpu.matmul %62, %63, %cst_34 {dimension_numbers = #tpu.dot_dimension_numbers<[1], [0], [0], [1], [0, 0, 1, 1], [], []>} : vector<16x8xf32>, vector<8x32xf32>, vector<16x32xf32> -> vector<16x32xf32>
    %65 = arith.addf %34, %64 : vector<16x32xf32>
    %c1 = arith.constant 1 : index
    %c0_35 = arith.constant 0 : index
    %c0_36 = arith.constant 0 : index
    %66 = vector.load %arg2[%c1, %c0_35, %c0_36] : memref<4x32x8xf32, #tpu.memory_space<vmem>>, vector<1x32x8xf32>
    %67 = vector.shape_cast %66 : vector<1x32x8xf32> to vector<32x8xf32>
    %cst_37 = arith.constant dense<0.000000e+00> : vector<16x8xf32>
    %68 = tpu.matmul %33, %67, %cst_37 {dimension_numbers = #tpu.dot_dimension_numbers<[1], [0], [0], [1], [0, 0, 1, 1], [], []>} : vector<16x32xf32>, vector<32x8xf32>, vector<16x8xf32> -> vector<16x8xf32>
    %69 = vector.shape_cast %68 : vector<16x8xf32> to vector<2x8x8xf32>
    %c1_38 = arith.constant 1 : index
    %c0_39 = arith.constant 0 : index
    %c0_40 = arith.constant 0 : index
    %70 = vector.load %arg3[%c1_38, %c0_39, %c0_40] : memref<4x32x8xf32, #tpu.memory_space<vmem>>, vector<1x32x8xf32>
    %71 = vector.shape_cast %70 : vector<1x32x8xf32> to vector<32x8xf32>
    %cst_41 = arith.constant dense<0.000000e+00> : vector<16x8xf32>
    %72 = tpu.matmul %33, %71, %cst_41 {dimension_numbers = #tpu.dot_dimension_numbers<[1], [0], [0], [1], [0, 0, 1, 1], [], []>} : vector<16x32xf32>, vector<32x8xf32>, vector<16x8xf32> -> vector<16x8xf32>
    %73 = vector.shape_cast %72 : vector<16x8xf32> to vector<2x8x8xf32>
    %c1_42 = arith.constant 1 : index
    %c0_43 = arith.constant 0 : index
    %c0_44 = arith.constant 0 : index
    %74 = vector.load %arg4[%c1_42, %c0_43, %c0_44] : memref<4x32x8xf32, #tpu.memory_space<vmem>>, vector<1x32x8xf32>
    %75 = vector.shape_cast %74 : vector<1x32x8xf32> to vector<32x8xf32>
    %cst_45 = arith.constant dense<0.000000e+00> : vector<16x8xf32>
    %76 = tpu.matmul %33, %75, %cst_45 {dimension_numbers = #tpu.dot_dimension_numbers<[1], [0], [0], [1], [0, 0, 1, 1], [], []>} : vector<16x32xf32>, vector<32x8xf32>, vector<16x8xf32> -> vector<16x8xf32>
    %77 = vector.shape_cast %76 : vector<16x8xf32> to vector<2x8x8xf32>
    "tpu.trace_start"() <{level = 10 : i32, message = "bqe,bke->bqk"}> : () -> ()
    %cst_46 = arith.constant dense<0.000000e+00> : vector<2x8x8xf32>
    %78 = tpu.matmul %69, %73, %cst_46 {dimension_numbers = #tpu.dot_dimension_numbers<[2], [2], [1], [1], [0, 0, 0, 1, 1, 1], [0], [0]>} : vector<2x8x8xf32>, vector<2x8x8xf32>, vector<2x8x8xf32> -> vector<2x8x8xf32>
    "tpu.trace_stop"() : () -> ()
    %79 = vector.shape_cast %7 : vector<8x8xf32> to vector<1x8x8xf32>
    %80 = vector.broadcast %79 : vector<1x8x8xf32> to vector<2x8x8xf32>
    %81 = arith.addf %78, %80 : vector<2x8x8xf32>
    %cst_47 = arith.constant dense<0xFF800000> : vector<2x8xf32>
    %82 = vector.multi_reduction <maximumf>, %81, %cst_47 [2] : vector<2x8x8xf32> to vector<2x8xf32>
    %83 = vector.shape_cast %82 : vector<2x8xf32> to vector<2x8x1xf32>
    %84 = vector.broadcast %83 : vector<2x8x1xf32> to vector<2x8x8xf32>
    %85 = arith.subf %81, %84 : vector<2x8x8xf32>
    %86 = math.exp %85 : vector<2x8x8xf32>
    %cst_48 = arith.constant dense<0.000000e+00> : vector<2x8xf32>
    %87 = vector.multi_reduction <add>, %86, %cst_48 [2] : vector<2x8x8xf32> to vector<2x8xf32>
    %88 = vector.shape_cast %87 : vector<2x8xf32> to vector<2x8x1xf32>
    %89 = tpu.reciprocal %88 : vector<2x8x1xf32> -> vector<2x8x1xf32>
    %90 = vector.broadcast %89 : vector<2x8x1xf32> to vector<2x8x8xf32>
    %91 = arith.mulf %86, %90 : vector<2x8x8xf32>
    "tpu.trace_start"() <{level = 10 : i32, message = "bqk,bke->bqe"}> : () -> ()
    %cst_49 = arith.constant dense<0.000000e+00> : vector<2x8x8xf32>
    %92 = tpu.matmul %91, %77, %cst_49 {dimension_numbers = #tpu.dot_dimension_numbers<[2], [1], [1], [2], [0, 0, 0, 1, 1, 2], [0], [0]>} : vector<2x8x8xf32>, vector<2x8x8xf32>, vector<2x8x8xf32> -> vector<2x8x8xf32>
    "tpu.trace_stop"() : () -> ()
    %93 = vector.shape_cast %92 : vector<2x8x8xf32> to vector<16x8xf32>
    %c8 = arith.constant 8 : index
    %c0_50 = arith.constant 0 : index
    %94 = vector.load %arg5[%c8, %c0_50] : memref<32x32xf32, #tpu.memory_space<vmem>>, vector<8x32xf32>
    %cst_51 = arith.constant dense<0.000000e+00> : vector<16x32xf32>
    %95 = tpu.matmul %93, %94, %cst_51 {dimension_numbers = #tpu.dot_dimension_numbers<[1], [0], [0], [1], [0, 0, 1, 1], [], []>} : vector<16x8xf32>, vector<8x32xf32>, vector<16x32xf32> -> vector<16x32xf32>
    %96 = arith.addf %65, %95 : vector<16x32xf32>
    %c2 = arith.constant 2 : index
    %c0_52 = arith.constant 0 : index
    %c0_53 = arith.constant 0 : index
    %97 = vector.load %arg2[%c2, %c0_52, %c0_53] : memref<4x32x8xf32, #tpu.memory_space<vmem>>, vector<1x32x8xf32>
    %98 = vector.shape_cast %97 : vector<1x32x8xf32> to vector<32x8xf32>
    %cst_54 = arith.constant dense<0.000000e+00> : vector<16x8xf32>
    %99 = tpu.matmul %33, %98, %cst_54 {dimension_numbers = #tpu.dot_dimension_numbers<[1], [0], [0], [1], [0, 0, 1, 1], [], []>} : vector<16x32xf32>, vector<32x8xf32>, vector<16x8xf32> -> vector<16x8xf32>
    %100 = vector.shape_cast %99 : vector<16x8xf32> to vector<2x8x8xf32>
    %c2_55 = arith.constant 2 : index
    %c0_56 = arith.constant 0 : index
    %c0_57 = arith.constant 0 : index
    %101 = vector.load %arg3[%c2_55, %c0_56, %c0_57] : memref<4x32x8xf32, #tpu.memory_space<vmem>>, vector<1x32x8xf32>
    %102 = vector.shape_cast %101 : vector<1x32x8xf32> to vector<32x8xf32>
    %cst_58 = arith.constant dense<0.000000e+00> : vector<16x8xf32>
    %103 = tpu.matmul %33, %102, %cst_58 {dimension_numbers = #tpu.dot_dimension_numbers<[1], [0], [0], [1], [0, 0, 1, 1], [], []>} : vector<16x32xf32>, vector<32x8xf32>, vector<16x8xf32> -> vector<16x8xf32>
    %104 = vector.shape_cast %103 : vector<16x8xf32> to vector<2x8x8xf32>
    %c2_59 = arith.constant 2 : index
    %c0_60 = arith.constant 0 : index
    %c0_61 = arith.constant 0 : index
    %105 = vector.load %arg4[%c2_59, %c0_60, %c0_61] : memref<4x32x8xf32, #tpu.memory_space<vmem>>, vector<1x32x8xf32>
    %106 = vector.shape_cast %105 : vector<1x32x8xf32> to vector<32x8xf32>
    %cst_62 = arith.constant dense<0.000000e+00> : vector<16x8xf32>
    %107 = tpu.matmul %33, %106, %cst_62 {dimension_numbers = #tpu.dot_dimension_numbers<[1], [0], [0], [1], [0, 0, 1, 1], [], []>} : vector<16x32xf32>, vector<32x8xf32>, vector<16x8xf32> -> vector<16x8xf32>
    %108 = vector.shape_cast %107 : vector<16x8xf32> to vector<2x8x8xf32>
    "tpu.trace_start"() <{level = 10 : i32, message = "bqe,bke->bqk"}> : () -> ()
    %cst_63 = arith.constant dense<0.000000e+00> : vector<2x8x8xf32>
    %109 = tpu.matmul %100, %104, %cst_63 {dimension_numbers = #tpu.dot_dimension_numbers<[2], [2], [1], [1], [0, 0, 0, 1, 1, 1], [0], [0]>} : vector<2x8x8xf32>, vector<2x8x8xf32>, vector<2x8x8xf32> -> vector<2x8x8xf32>
    "tpu.trace_stop"() : () -> ()
    %110 = vector.shape_cast %7 : vector<8x8xf32> to vector<1x8x8xf32>
    %111 = vector.broadcast %110 : vector<1x8x8xf32> to vector<2x8x8xf32>
    %112 = arith.addf %109, %111 : vector<2x8x8xf32>
    %cst_64 = arith.constant dense<0xFF800000> : vector<2x8xf32>
    %113 = vector.multi_reduction <maximumf>, %112, %cst_64 [2] : vector<2x8x8xf32> to vector<2x8xf32>
    %114 = vector.shape_cast %113 : vector<2x8xf32> to vector<2x8x1xf32>
    %115 = vector.broadcast %114 : vector<2x8x1xf32> to vector<2x8x8xf32>
    %116 = arith.subf %112, %115 : vector<2x8x8xf32>
    %117 = math.exp %116 : vector<2x8x8xf32>
    %cst_65 = arith.constant dense<0.000000e+00> : vector<2x8xf32>
    %118 = vector.multi_reduction <add>, %117, %cst_65 [2] : vector<2x8x8xf32> to vector<2x8xf32>
    %119 = vector.shape_cast %118 : vector<2x8xf32> to vector<2x8x1xf32>
    %120 = tpu.reciprocal %119 : vector<2x8x1xf32> -> vector<2x8x1xf32>
    %121 = vector.broadcast %120 : vector<2x8x1xf32> to vector<2x8x8xf32>
    %122 = arith.mulf %117, %121 : vector<2x8x8xf32>
    "tpu.trace_start"() <{level = 10 : i32, message = "bqk,bke->bqe"}> : () -> ()
    %cst_66 = arith.constant dense<0.000000e+00> : vector<2x8x8xf32>
    %123 = tpu.matmul %122, %108, %cst_66 {dimension_numbers = #tpu.dot_dimension_numbers<[2], [1], [1], [2], [0, 0, 0, 1, 1, 2], [0], [0]>} : vector<2x8x8xf32>, vector<2x8x8xf32>, vector<2x8x8xf32> -> vector<2x8x8xf32>
    "tpu.trace_stop"() : () -> ()
    %124 = vector.shape_cast %123 : vector<2x8x8xf32> to vector<16x8xf32>
    %c16 = arith.constant 16 : index
    %c0_67 = arith.constant 0 : index
    %125 = vector.load %arg5[%c16, %c0_67] : memref<32x32xf32, #tpu.memory_space<vmem>>, vector<8x32xf32>
    %cst_68 = arith.constant dense<0.000000e+00> : vector<16x32xf32>
    %126 = tpu.matmul %124, %125, %cst_68 {dimension_numbers = #tpu.dot_dimension_numbers<[1], [0], [0], [1], [0, 0, 1, 1], [], []>} : vector<16x8xf32>, vector<8x32xf32>, vector<16x32xf32> -> vector<16x32xf32>
    %127 = arith.addf %96, %126 : vector<16x32xf32>
    %c3 = arith.constant 3 : index
    %c0_69 = arith.constant 0 : index
    %c0_70 = arith.constant 0 : index
    %128 = vector.load %arg2[%c3, %c0_69, %c0_70] : memref<4x32x8xf32, #tpu.memory_space<vmem>>, vector<1x32x8xf32>
    %129 = vector.shape_cast %128 : vector<1x32x8xf32> to vector<32x8xf32>
    %cst_71 = arith.constant dense<0.000000e+00> : vector<16x8xf32>
    %130 = tpu.matmul %33, %129, %cst_71 {dimension_numbers = #tpu.dot_dimension_numbers<[1], [0], [0], [1], [0, 0, 1, 1], [], []>} : vector<16x32xf32>, vector<32x8xf32>, vector<16x8xf32> -> vector<16x8xf32>
    %131 = vector.shape_cast %130 : vector<16x8xf32> to vector<2x8x8xf32>
    %c3_72 = arith.constant 3 : index
    %c0_73 = arith.constant 0 : index
    %c0_74 = arith.constant 0 : index
    %132 = vector.load %arg3[%c3_72, %c0_73, %c0_74] : memref<4x32x8xf32, #tpu.memory_space<vmem>>, vector<1x32x8xf32>
    %133 = vector.shape_cast %132 : vector<1x32x8xf32> to vector<32x8xf32>
    %cst_75 = arith.constant dense<0.000000e+00> : vector<16x8xf32>
    %134 = tpu.matmul %33, %133, %cst_75 {dimension_numbers = #tpu.dot_dimension_numbers<[1], [0], [0], [1], [0, 0, 1, 1], [], []>} : vector<16x32xf32>, vector<32x8xf32>, vector<16x8xf32> -> vector<16x8xf32>
    %135 = vector.shape_cast %134 : vector<16x8xf32> to vector<2x8x8xf32>
    %c3_76 = arith.constant 3 : index
    %c0_77 = arith.constant 0 : index
    %c0_78 = arith.constant 0 : index
    %136 = vector.load %arg4[%c3_76, %c0_77, %c0_78] : memref<4x32x8xf32, #tpu.memory_space<vmem>>, vector<1x32x8xf32>
    %137 = vector.shape_cast %136 : vector<1x32x8xf32> to vector<32x8xf32>
    %cst_79 = arith.constant dense<0.000000e+00> : vector<16x8xf32>
    %138 = tpu.matmul %33, %137, %cst_79 {dimension_numbers = #tpu.dot_dimension_numbers<[1], [0], [0], [1], [0, 0, 1, 1], [], []>} : vector<16x32xf32>, vector<32x8xf32>, vector<16x8xf32> -> vector<16x8xf32>
    %139 = vector.shape_cast %138 : vector<16x8xf32> to vector<2x8x8xf32>
    "tpu.trace_start"() <{level = 10 : i32, message = "bqe,bke->bqk"}> : () -> ()
    %cst_80 = arith.constant dense<0.000000e+00> : vector<2x8x8xf32>
    %140 = tpu.matmul %131, %135, %cst_80 {dimension_numbers = #tpu.dot_dimension_numbers<[2], [2], [1], [1], [0, 0, 0, 1, 1, 1], [0], [0]>} : vector<2x8x8xf32>, vector<2x8x8xf32>, vector<2x8x8xf32> -> vector<2x8x8xf32>
    "tpu.trace_stop"() : () -> ()
    %141 = vector.shape_cast %7 : vector<8x8xf32> to vector<1x8x8xf32>
    %142 = vector.broadcast %141 : vector<1x8x8xf32> to vector<2x8x8xf32>
    %143 = arith.addf %140, %142 : vector<2x8x8xf32>
    %cst_81 = arith.constant dense<0xFF800000> : vector<2x8xf32>
    %144 = vector.multi_reduction <maximumf>, %143, %cst_81 [2] : vector<2x8x8xf32> to vector<2x8xf32>
    %145 = vector.shape_cast %144 : vector<2x8xf32> to vector<2x8x1xf32>
    %146 = vector.broadcast %145 : vector<2x8x1xf32> to vector<2x8x8xf32>
    %147 = arith.subf %143, %146 : vector<2x8x8xf32>
    %148 = math.exp %147 : vector<2x8x8xf32>
    %cst_82 = arith.constant dense<0.000000e+00> : vector<2x8xf32>
    %149 = vector.multi_reduction <add>, %148, %cst_82 [2] : vector<2x8x8xf32> to vector<2x8xf32>
    %150 = vector.shape_cast %149 : vector<2x8xf32> to vector<2x8x1xf32>
    %151 = tpu.reciprocal %150 : vector<2x8x1xf32> -> vector<2x8x1xf32>
    %152 = vector.broadcast %151 : vector<2x8x1xf32> to vector<2x8x8xf32>
    %153 = arith.mulf %148, %152 : vector<2x8x8xf32>
    "tpu.trace_start"() <{level = 10 : i32, message = "bqk,bke->bqe"}> : () -> ()
    %cst_83 = arith.constant dense<0.000000e+00> : vector<2x8x8xf32>
    %154 = tpu.matmul %153, %139, %cst_83 {dimension_numbers = #tpu.dot_dimension_numbers<[2], [1], [1], [2], [0, 0, 0, 1, 1, 2], [0], [0]>} : vector<2x8x8xf32>, vector<2x8x8xf32>, vector<2x8x8xf32> -> vector<2x8x8xf32>
    "tpu.trace_stop"() : () -> ()
    %155 = vector.shape_cast %154 : vector<2x8x8xf32> to vector<16x8xf32>
    %c24 = arith.constant 24 : index
    %c0_84 = arith.constant 0 : index
    %156 = vector.load %arg5[%c24, %c0_84] : memref<32x32xf32, #tpu.memory_space<vmem>>, vector<8x32xf32>
    %cst_85 = arith.constant dense<0.000000e+00> : vector<16x32xf32>
    %157 = tpu.matmul %155, %156, %cst_85 {dimension_numbers = #tpu.dot_dimension_numbers<[1], [0], [0], [1], [0, 0, 1, 1], [], []>} : vector<16x8xf32>, vector<8x32xf32>, vector<16x32xf32> -> vector<16x32xf32>
    %158 = arith.addf %127, %157 : vector<16x32xf32>
    %159 = arith.addf %8, %158 : vector<16x32xf32>
    %160 = vector.shape_cast %159 : vector<16x32xf32> to vector<2x8x32xf32>
    %cst_86 = arith.constant dense<0.000000e+00> : vector<2x8xf32>
    %161 = vector.multi_reduction <add>, %160, %cst_86 [2] : vector<2x8x32xf32> to vector<2x8xf32>
    %162 = vector.shape_cast %161 : vector<2x8xf32> to vector<2x8x1xf32>
    %cst_87 = arith.constant 3.200000e+01 : f32
    %163 = vector.broadcast %cst_87 : f32 to vector<2x8x1xf32>
    %164 = arith.divf %162, %163 : vector<2x8x1xf32>
    %cst_88 = arith.constant dense<0.000000e+00> : vector<2x1xf32>
    %165 = vector.multi_reduction <add>, %164, %cst_88 [1] : vector<2x8x1xf32> to vector<2x1xf32>
    %166 = vector.shape_cast %165 : vector<2x1xf32> to vector<2x1x1xf32>
    %cst_89 = arith.constant 8.000000e+00 : f32
    %167 = vector.broadcast %cst_89 : f32 to vector<2x1x1xf32>
    %168 = arith.divf %166, %167 : vector<2x1x1xf32>
    %169 = vector.broadcast %168 : vector<2x1x1xf32> to vector<2x8x32xf32>
    %170 = arith.subf %160, %169 : vector<2x8x32xf32>
    %171 = arith.mulf %170, %170 : vector<2x8x32xf32>
    %cst_90 = arith.constant dense<0.000000e+00> : vector<2x8xf32>
    %172 = vector.multi_reduction <add>, %171, %cst_90 [2] : vector<2x8x32xf32> to vector<2x8xf32>
    %173 = vector.shape_cast %172 : vector<2x8xf32> to vector<2x8x1xf32>
    %cst_91 = arith.constant 3.200000e+01 : f32
    %174 = vector.broadcast %cst_91 : f32 to vector<2x8x1xf32>
    %175 = arith.divf %173, %174 : vector<2x8x1xf32>
    %cst_92 = arith.constant dense<0.000000e+00> : vector<2x1xf32>
    %176 = vector.multi_reduction <add>, %175, %cst_92 [1] : vector<2x8x1xf32> to vector<2x1xf32>
    %177 = vector.shape_cast %176 : vector<2x1xf32> to vector<2x1x1xf32>
    %cst_93 = arith.constant 8.000000e+00 : f32
    %178 = vector.broadcast %cst_93 : f32 to vector<2x1x1xf32>
    %179 = arith.divf %177, %178 : vector<2x1x1xf32>
    %cst_94 = arith.constant 9.99999974E-6 : f32
    %180 = vector.broadcast %cst_94 : f32 to vector<2x1x1xf32>
    %181 = arith.addf %179, %180 : vector<2x1x1xf32>
    %182 = math.rsqrt %181 : vector<2x1x1xf32>
    %183 = vector.broadcast %182 : vector<2x1x1xf32> to vector<2x8x32xf32>
    %184 = arith.mulf %170, %183 : vector<2x8x32xf32>
    %185 = vector.shape_cast %184 : vector<2x8x32xf32> to vector<16x32xf32>
    %cst_95 = arith.constant dense<0.000000e+00> : vector<2x8xf32>
    %186 = vector.multi_reduction <add>, %0, %cst_95 [2] : vector<2x8x32xf32> to vector<2x8xf32>
    %187 = vector.shape_cast %186 : vector<2x8xf32> to vector<2x8x1xf32>
    %cst_96 = arith.constant 3.200000e+01 : f32
    %188 = vector.broadcast %cst_96 : f32 to vector<2x8x1xf32>
    %189 = arith.divf %187, %188 : vector<2x8x1xf32>
    %cst_97 = arith.constant dense<0.000000e+00> : vector<2x1xf32>
    %190 = vector.multi_reduction <add>, %189, %cst_97 [1] : vector<2x8x1xf32> to vector<2x1xf32>
    %191 = vector.shape_cast %190 : vector<2x1xf32> to vector<2x1x1xf32>
    %cst_98 = arith.constant 8.000000e+00 : f32
    %192 = vector.broadcast %cst_98 : f32 to vector<2x1x1xf32>
    %193 = arith.divf %191, %192 : vector<2x1x1xf32>
    %194 = vector.broadcast %193 : vector<2x1x1xf32> to vector<2x8x32xf32>
    %195 = arith.subf %0, %194 : vector<2x8x32xf32>
    %196 = arith.mulf %195, %195 : vector<2x8x32xf32>
    %cst_99 = arith.constant dense<0.000000e+00> : vector<2x8xf32>
    %197 = vector.multi_reduction <add>, %196, %cst_99 [2] : vector<2x8x32xf32> to vector<2x8xf32>
    %198 = vector.shape_cast %197 : vector<2x8xf32> to vector<2x8x1xf32>
    %cst_100 = arith.constant 3.200000e+01 : f32
    %199 = vector.broadcast %cst_100 : f32 to vector<2x8x1xf32>
    %200 = arith.divf %198, %199 : vector<2x8x1xf32>
    %cst_101 = arith.constant dense<0.000000e+00> : vector<2x1xf32>
    %201 = vector.multi_reduction <add>, %200, %cst_101 [1] : vector<2x8x1xf32> to vector<2x1xf32>
    %202 = vector.shape_cast %201 : vector<2x1xf32> to vector<2x1x1xf32>
    %cst_102 = arith.constant 8.000000e+00 : f32
    %203 = vector.broadcast %cst_102 : f32 to vector<2x1x1xf32>
    %204 = arith.divf %202, %203 : vector<2x1x1xf32>
    %cst_103 = arith.constant 9.99999974E-6 : f32
    %205 = vector.broadcast %cst_103 : f32 to vector<2x1x1xf32>
    %206 = arith.addf %204, %205 : vector<2x1x1xf32>
    %207 = math.rsqrt %206 : vector<2x1x1xf32>
    %208 = vector.broadcast %207 : vector<2x1x1xf32> to vector<2x8x32xf32>
    %209 = arith.mulf %195, %208 : vector<2x8x32xf32>
    %210 = vector.shape_cast %209 : vector<2x8x32xf32> to vector<16x32xf32>
    %cst_104 = arith.constant 0.000000e+00 : f32
    %211 = vector.broadcast %cst_104 : f32 to vector<16x32xf32>
    %c0_105 = arith.constant 0 : index
    %c0_106 = arith.constant 0 : index
    %c0_107 = arith.constant 0 : index
    %212 = vector.load %arg6[%c0_105, %c0_106, %c0_107] : memref<4x32x8xf32, #tpu.memory_space<vmem>>, vector<1x32x8xf32>
    %213 = vector.shape_cast %212 : vector<1x32x8xf32> to vector<32x8xf32>
    %cst_108 = arith.constant dense<0.000000e+00> : vector<16x8xf32>
    %214 = tpu.matmul %185, %213, %cst_108 {dimension_numbers = #tpu.dot_dimension_numbers<[1], [0], [0], [1], [0, 0, 1, 1], [], []>} : vector<16x32xf32>, vector<32x8xf32>, vector<16x8xf32> -> vector<16x8xf32>
    %215 = vector.shape_cast %214 : vector<16x8xf32> to vector<2x8x8xf32>
    %c0_109 = arith.constant 0 : index
    %c0_110 = arith.constant 0 : index
    %c0_111 = arith.constant 0 : index
    %216 = vector.load %arg7[%c0_109, %c0_110, %c0_111] : memref<4x32x8xf32, #tpu.memory_space<vmem>>, vector<1x32x8xf32>
    %217 = vector.shape_cast %216 : vector<1x32x8xf32> to vector<32x8xf32>
    %cst_112 = arith.constant dense<0.000000e+00> : vector<16x8xf32>
    %218 = tpu.matmul %210, %217, %cst_112 {dimension_numbers = #tpu.dot_dimension_numbers<[1], [0], [0], [1], [0, 0, 1, 1], [], []>} : vector<16x32xf32>, vector<32x8xf32>, vector<16x8xf32> -> vector<16x8xf32>
    %219 = vector.shape_cast %218 : vector<16x8xf32> to vector<2x8x8xf32>
    %c0_113 = arith.constant 0 : index
    %c0_114 = arith.constant 0 : index
    %c0_115 = arith.constant 0 : index
    %220 = vector.load %arg8[%c0_113, %c0_114, %c0_115] : memref<4x32x8xf32, #tpu.memory_space<vmem>>, vector<1x32x8xf32>
    %221 = vector.shape_cast %220 : vector<1x32x8xf32> to vector<32x8xf32>
    %cst_116 = arith.constant dense<0.000000e+00> : vector<16x8xf32>
    %222 = tpu.matmul %210, %221, %cst_116 {dimension_numbers = #tpu.dot_dimension_numbers<[1], [0], [0], [1], [0, 0, 1, 1], [], []>} : vector<16x32xf32>, vector<32x8xf32>, vector<16x8xf32> -> vector<16x8xf32>
    %223 = vector.shape_cast %222 : vector<16x8xf32> to vector<2x8x8xf32>
    "tpu.trace_start"() <{level = 10 : i32, message = "bqe,bke->bqk"}> : () -> ()
    %cst_117 = arith.constant dense<0.000000e+00> : vector<2x8x8xf32>
    %224 = tpu.matmul %215, %219, %cst_117 {dimension_numbers = #tpu.dot_dimension_numbers<[2], [2], [1], [1], [0, 0, 0, 1, 1, 1], [0], [0]>} : vector<2x8x8xf32>, vector<2x8x8xf32>, vector<2x8x8xf32> -> vector<2x8x8xf32>
    "tpu.trace_stop"() : () -> ()
    %cst_118 = arith.constant dense<0xFF800000> : vector<2x8xf32>
    %225 = vector.multi_reduction <maximumf>, %224, %cst_118 [2] : vector<2x8x8xf32> to vector<2x8xf32>
    %226 = vector.shape_cast %225 : vector<2x8xf32> to vector<2x8x1xf32>
    %227 = vector.broadcast %226 : vector<2x8x1xf32> to vector<2x8x8xf32>
    %228 = arith.subf %224, %227 : vector<2x8x8xf32>
    %229 = math.exp %228 : vector<2x8x8xf32>
    %cst_119 = arith.constant dense<0.000000e+00> : vector<2x8xf32>
    %230 = vector.multi_reduction <add>, %229, %cst_119 [2] : vector<2x8x8xf32> to vector<2x8xf32>
    %231 = vector.shape_cast %230 : vector<2x8xf32> to vector<2x8x1xf32>
    %232 = tpu.reciprocal %231 : vector<2x8x1xf32> -> vector<2x8x1xf32>
    %233 = vector.broadcast %232 : vector<2x8x1xf32> to vector<2x8x8xf32>
    %234 = arith.mulf %229, %233 : vector<2x8x8xf32>
    "tpu.trace_start"() <{level = 10 : i32, message = "bqk,bke->bqe"}> : () -> ()
    %cst_120 = arith.constant dense<0.000000e+00> : vector<2x8x8xf32>
    %235 = tpu.matmul %234, %223, %cst_120 {dimension_numbers = #tpu.dot_dimension_numbers<[2], [1], [1], [2], [0, 0, 0, 1, 1, 2], [0], [0]>} : vector<2x8x8xf32>, vector<2x8x8xf32>, vector<2x8x8xf32> -> vector<2x8x8xf32>
    "tpu.trace_stop"() : () -> ()
    %236 = vector.shape_cast %235 : vector<2x8x8xf32> to vector<16x8xf32>
    %c0_121 = arith.constant 0 : index
    %c0_122 = arith.constant 0 : index
    %237 = vector.load %arg9[%c0_121, %c0_122] : memref<32x32xf32, #tpu.memory_space<vmem>>, vector<8x32xf32>
    %cst_123 = arith.constant dense<0.000000e+00> : vector<16x32xf32>
    %238 = tpu.matmul %236, %237, %cst_123 {dimension_numbers = #tpu.dot_dimension_numbers<[1], [0], [0], [1], [0, 0, 1, 1], [], []>} : vector<16x8xf32>, vector<8x32xf32>, vector<16x32xf32> -> vector<16x32xf32>
    %239 = arith.addf %211, %238 : vector<16x32xf32>
    %c1_124 = arith.constant 1 : index
    %c0_125 = arith.constant 0 : index
    %c0_126 = arith.constant 0 : index
    %240 = vector.load %arg6[%c1_124, %c0_125, %c0_126] : memref<4x32x8xf32, #tpu.memory_space<vmem>>, vector<1x32x8xf32>
    %241 = vector.shape_cast %240 : vector<1x32x8xf32> to vector<32x8xf32>
    %cst_127 = arith.constant dense<0.000000e+00> : vector<16x8xf32>
    %242 = tpu.matmul %185, %241, %cst_127 {dimension_numbers = #tpu.dot_dimension_numbers<[1], [0], [0], [1], [0, 0, 1, 1], [], []>} : vector<16x32xf32>, vector<32x8xf32>, vector<16x8xf32> -> vector<16x8xf32>
    %243 = vector.shape_cast %242 : vector<16x8xf32> to vector<2x8x8xf32>
    %c1_128 = arith.constant 1 : index
    %c0_129 = arith.constant 0 : index
    %c0_130 = arith.constant 0 : index
    %244 = vector.load %arg7[%c1_128, %c0_129, %c0_130] : memref<4x32x8xf32, #tpu.memory_space<vmem>>, vector<1x32x8xf32>
    %245 = vector.shape_cast %244 : vector<1x32x8xf32> to vector<32x8xf32>
    %cst_131 = arith.constant dense<0.000000e+00> : vector<16x8xf32>
    %246 = tpu.matmul %210, %245, %cst_131 {dimension_numbers = #tpu.dot_dimension_numbers<[1], [0], [0], [1], [0, 0, 1, 1], [], []>} : vector<16x32xf32>, vector<32x8xf32>, vector<16x8xf32> -> vector<16x8xf32>
    %247 = vector.shape_cast %246 : vector<16x8xf32> to vector<2x8x8xf32>
    %c1_132 = arith.constant 1 : index
    %c0_133 = arith.constant 0 : index
    %c0_134 = arith.constant 0 : index
    %248 = vector.load %arg8[%c1_132, %c0_133, %c0_134] : memref<4x32x8xf32, #tpu.memory_space<vmem>>, vector<1x32x8xf32>
    %249 = vector.shape_cast %248 : vector<1x32x8xf32> to vector<32x8xf32>
    %cst_135 = arith.constant dense<0.000000e+00> : vector<16x8xf32>
    %250 = tpu.matmul %210, %249, %cst_135 {dimension_numbers = #tpu.dot_dimension_numbers<[1], [0], [0], [1], [0, 0, 1, 1], [], []>} : vector<16x32xf32>, vector<32x8xf32>, vector<16x8xf32> -> vector<16x8xf32>
    %251 = vector.shape_cast %250 : vector<16x8xf32> to vector<2x8x8xf32>
    "tpu.trace_start"() <{level = 10 : i32, message = "bqe,bke->bqk"}> : () -> ()
    %cst_136 = arith.constant dense<0.000000e+00> : vector<2x8x8xf32>
    %252 = tpu.matmul %243, %247, %cst_136 {dimension_numbers = #tpu.dot_dimension_numbers<[2], [2], [1], [1], [0, 0, 0, 1, 1, 1], [0], [0]>} : vector<2x8x8xf32>, vector<2x8x8xf32>, vector<2x8x8xf32> -> vector<2x8x8xf32>
    "tpu.trace_stop"() : () -> ()
    %cst_137 = arith.constant dense<0xFF800000> : vector<2x8xf32>
    %253 = vector.multi_reduction <maximumf>, %252, %cst_137 [2] : vector<2x8x8xf32> to vector<2x8xf32>
    %254 = vector.shape_cast %253 : vector<2x8xf32> to vector<2x8x1xf32>
    %255 = vector.broadcast %254 : vector<2x8x1xf32> to vector<2x8x8xf32>
    %256 = arith.subf %252, %255 : vector<2x8x8xf32>
    %257 = math.exp %256 : vector<2x8x8xf32>
    %cst_138 = arith.constant dense<0.000000e+00> : vector<2x8xf32>
    %258 = vector.multi_reduction <add>, %257, %cst_138 [2] : vector<2x8x8xf32> to vector<2x8xf32>
    %259 = vector.shape_cast %258 : vector<2x8xf32> to vector<2x8x1xf32>
    %260 = tpu.reciprocal %259 : vector<2x8x1xf32> -> vector<2x8x1xf32>
    %261 = vector.broadcast %260 : vector<2x8x1xf32> to vector<2x8x8xf32>
    %262 = arith.mulf %257, %261 : vector<2x8x8xf32>
    "tpu.trace_start"() <{level = 10 : i32, message = "bqk,bke->bqe"}> : () -> ()
    %cst_139 = arith.constant dense<0.000000e+00> : vector<2x8x8xf32>
    %263 = tpu.matmul %262, %251, %cst_139 {dimension_numbers = #tpu.dot_dimension_numbers<[2], [1], [1], [2], [0, 0, 0, 1, 1, 2], [0], [0]>} : vector<2x8x8xf32>, vector<2x8x8xf32>, vector<2x8x8xf32> -> vector<2x8x8xf32>
    "tpu.trace_stop"() : () -> ()
    %264 = vector.shape_cast %263 : vector<2x8x8xf32> to vector<16x8xf32>
    %c8_140 = arith.constant 8 : index
    %c0_141 = arith.constant 0 : index
    %265 = vector.load %arg9[%c8_140, %c0_141] : memref<32x32xf32, #tpu.memory_space<vmem>>, vector<8x32xf32>
    %cst_142 = arith.constant dense<0.000000e+00> : vector<16x32xf32>
    %266 = tpu.matmul %264, %265, %cst_142 {dimension_numbers = #tpu.dot_dimension_numbers<[1], [0], [0], [1], [0, 0, 1, 1], [], []>} : vector<16x8xf32>, vector<8x32xf32>, vector<16x32xf32> -> vector<16x32xf32>
    %267 = arith.addf %239, %266 : vector<16x32xf32>
    %c2_143 = arith.constant 2 : index
    %c0_144 = arith.constant 0 : index
    %c0_145 = arith.constant 0 : index
    %268 = vector.load %arg6[%c2_143, %c0_144, %c0_145] : memref<4x32x8xf32, #tpu.memory_space<vmem>>, vector<1x32x8xf32>
    %269 = vector.shape_cast %268 : vector<1x32x8xf32> to vector<32x8xf32>
    %cst_146 = arith.constant dense<0.000000e+00> : vector<16x8xf32>
    %270 = tpu.matmul %185, %269, %cst_146 {dimension_numbers = #tpu.dot_dimension_numbers<[1], [0], [0], [1], [0, 0, 1, 1], [], []>} : vector<16x32xf32>, vector<32x8xf32>, vector<16x8xf32> -> vector<16x8xf32>
    %271 = vector.shape_cast %270 : vector<16x8xf32> to vector<2x8x8xf32>
    %c2_147 = arith.constant 2 : index
    %c0_148 = arith.constant 0 : index
    %c0_149 = arith.constant 0 : index
    %272 = vector.load %arg7[%c2_147, %c0_148, %c0_149] : memref<4x32x8xf32, #tpu.memory_space<vmem>>, vector<1x32x8xf32>
    %273 = vector.shape_cast %272 : vector<1x32x8xf32> to vector<32x8xf32>
    %cst_150 = arith.constant dense<0.000000e+00> : vector<16x8xf32>
    %274 = tpu.matmul %210, %273, %cst_150 {dimension_numbers = #tpu.dot_dimension_numbers<[1], [0], [0], [1], [0, 0, 1, 1], [], []>} : vector<16x32xf32>, vector<32x8xf32>, vector<16x8xf32> -> vector<16x8xf32>
    %275 = vector.shape_cast %274 : vector<16x8xf32> to vector<2x8x8xf32>
    %c2_151 = arith.constant 2 : index
    %c0_152 = arith.constant 0 : index
    %c0_153 = arith.constant 0 : index
    %276 = vector.load %arg8[%c2_151, %c0_152, %c0_153] : memref<4x32x8xf32, #tpu.memory_space<vmem>>, vector<1x32x8xf32>
    %277 = vector.shape_cast %276 : vector<1x32x8xf32> to vector<32x8xf32>
    %cst_154 = arith.constant dense<0.000000e+00> : vector<16x8xf32>
    %278 = tpu.matmul %210, %277, %cst_154 {dimension_numbers = #tpu.dot_dimension_numbers<[1], [0], [0], [1], [0, 0, 1, 1], [], []>} : vector<16x32xf32>, vector<32x8xf32>, vector<16x8xf32> -> vector<16x8xf32>
    %279 = vector.shape_cast %278 : vector<16x8xf32> to vector<2x8x8xf32>
    "tpu.trace_start"() <{level = 10 : i32, message = "bqe,bke->bqk"}> : () -> ()
    %cst_155 = arith.constant dense<0.000000e+00> : vector<2x8x8xf32>
    %280 = tpu.matmul %271, %275, %cst_155 {dimension_numbers = #tpu.dot_dimension_numbers<[2], [2], [1], [1], [0, 0, 0, 1, 1, 1], [0], [0]>} : vector<2x8x8xf32>, vector<2x8x8xf32>, vector<2x8x8xf32> -> vector<2x8x8xf32>
    "tpu.trace_stop"() : () -> ()
    %cst_156 = arith.constant dense<0xFF800000> : vector<2x8xf32>
    %281 = vector.multi_reduction <maximumf>, %280, %cst_156 [2] : vector<2x8x8xf32> to vector<2x8xf32>
    %282 = vector.shape_cast %281 : vector<2x8xf32> to vector<2x8x1xf32>
    %283 = vector.broadcast %282 : vector<2x8x1xf32> to vector<2x8x8xf32>
    %284 = arith.subf %280, %283 : vector<2x8x8xf32>
    %285 = math.exp %284 : vector<2x8x8xf32>
    %cst_157 = arith.constant dense<0.000000e+00> : vector<2x8xf32>
    %286 = vector.multi_reduction <add>, %285, %cst_157 [2] : vector<2x8x8xf32> to vector<2x8xf32>
    %287 = vector.shape_cast %286 : vector<2x8xf32> to vector<2x8x1xf32>
    %288 = tpu.reciprocal %287 : vector<2x8x1xf32> -> vector<2x8x1xf32>
    %289 = vector.broadcast %288 : vector<2x8x1xf32> to vector<2x8x8xf32>
    %290 = arith.mulf %285, %289 : vector<2x8x8xf32>
    "tpu.trace_start"() <{level = 10 : i32, message = "bqk,bke->bqe"}> : () -> ()
    %cst_158 = arith.constant dense<0.000000e+00> : vector<2x8x8xf32>
    %291 = tpu.matmul %290, %279, %cst_158 {dimension_numbers = #tpu.dot_dimension_numbers<[2], [1], [1], [2], [0, 0, 0, 1, 1, 2], [0], [0]>} : vector<2x8x8xf32>, vector<2x8x8xf32>, vector<2x8x8xf32> -> vector<2x8x8xf32>
    "tpu.trace_stop"() : () -> ()
    %292 = vector.shape_cast %291 : vector<2x8x8xf32> to vector<16x8xf32>
    %c16_159 = arith.constant 16 : index
    %c0_160 = arith.constant 0 : index
    %293 = vector.load %arg9[%c16_159, %c0_160] : memref<32x32xf32, #tpu.memory_space<vmem>>, vector<8x32xf32>
    %cst_161 = arith.constant dense<0.000000e+00> : vector<16x32xf32>
    %294 = tpu.matmul %292, %293, %cst_161 {dimension_numbers = #tpu.dot_dimension_numbers<[1], [0], [0], [1], [0, 0, 1, 1], [], []>} : vector<16x8xf32>, vector<8x32xf32>, vector<16x32xf32> -> vector<16x32xf32>
    %295 = arith.addf %267, %294 : vector<16x32xf32>
    %c3_162 = arith.constant 3 : index
    %c0_163 = arith.constant 0 : index
    %c0_164 = arith.constant 0 : index
    %296 = vector.load %arg6[%c3_162, %c0_163, %c0_164] : memref<4x32x8xf32, #tpu.memory_space<vmem>>, vector<1x32x8xf32>
    %297 = vector.shape_cast %296 : vector<1x32x8xf32> to vector<32x8xf32>
    %cst_165 = arith.constant dense<0.000000e+00> : vector<16x8xf32>
    %298 = tpu.matmul %185, %297, %cst_165 {dimension_numbers = #tpu.dot_dimension_numbers<[1], [0], [0], [1], [0, 0, 1, 1], [], []>} : vector<16x32xf32>, vector<32x8xf32>, vector<16x8xf32> -> vector<16x8xf32>
    %299 = vector.shape_cast %298 : vector<16x8xf32> to vector<2x8x8xf32>
    %c3_166 = arith.constant 3 : index
    %c0_167 = arith.constant 0 : index
    %c0_168 = arith.constant 0 : index
    %300 = vector.load %arg7[%c3_166, %c0_167, %c0_168] : memref<4x32x8xf32, #tpu.memory_space<vmem>>, vector<1x32x8xf32>
    %301 = vector.shape_cast %300 : vector<1x32x8xf32> to vector<32x8xf32>
    %cst_169 = arith.constant dense<0.000000e+00> : vector<16x8xf32>
    %302 = tpu.matmul %210, %301, %cst_169 {dimension_numbers = #tpu.dot_dimension_numbers<[1], [0], [0], [1], [0, 0, 1, 1], [], []>} : vector<16x32xf32>, vector<32x8xf32>, vector<16x8xf32> -> vector<16x8xf32>
    %303 = vector.shape_cast %302 : vector<16x8xf32> to vector<2x8x8xf32>
    %c3_170 = arith.constant 3 : index
    %c0_171 = arith.constant 0 : index
    %c0_172 = arith.constant 0 : index
    %304 = vector.load %arg8[%c3_170, %c0_171, %c0_172] : memref<4x32x8xf32, #tpu.memory_space<vmem>>, vector<1x32x8xf32>
    %305 = vector.shape_cast %304 : vector<1x32x8xf32> to vector<32x8xf32>
    %cst_173 = arith.constant dense<0.000000e+00> : vector<16x8xf32>
    %306 = tpu.matmul %210, %305, %cst_173 {dimension_numbers = #tpu.dot_dimension_numbers<[1], [0], [0], [1], [0, 0, 1, 1], [], []>} : vector<16x32xf32>, vector<32x8xf32>, vector<16x8xf32> -> vector<16x8xf32>
    %307 = vector.shape_cast %306 : vector<16x8xf32> to vector<2x8x8xf32>
    "tpu.trace_start"() <{level = 10 : i32, message = "bqe,bke->bqk"}> : () -> ()
    %cst_174 = arith.constant dense<0.000000e+00> : vector<2x8x8xf32>
    %308 = tpu.matmul %299, %303, %cst_174 {dimension_numbers = #tpu.dot_dimension_numbers<[2], [2], [1], [1], [0, 0, 0, 1, 1, 1], [0], [0]>} : vector<2x8x8xf32>, vector<2x8x8xf32>, vector<2x8x8xf32> -> vector<2x8x8xf32>
    "tpu.trace_stop"() : () -> ()
    %cst_175 = arith.constant dense<0xFF800000> : vector<2x8xf32>
    %309 = vector.multi_reduction <maximumf>, %308, %cst_175 [2] : vector<2x8x8xf32> to vector<2x8xf32>
    %310 = vector.shape_cast %309 : vector<2x8xf32> to vector<2x8x1xf32>
    %311 = vector.broadcast %310 : vector<2x8x1xf32> to vector<2x8x8xf32>
    %312 = arith.subf %308, %311 : vector<2x8x8xf32>
    %313 = math.exp %312 : vector<2x8x8xf32>
    %cst_176 = arith.constant dense<0.000000e+00> : vector<2x8xf32>
    %314 = vector.multi_reduction <add>, %313, %cst_176 [2] : vector<2x8x8xf32> to vector<2x8xf32>
    %315 = vector.shape_cast %314 : vector<2x8xf32> to vector<2x8x1xf32>
    %316 = tpu.reciprocal %315 : vector<2x8x1xf32> -> vector<2x8x1xf32>
    %317 = vector.broadcast %316 : vector<2x8x1xf32> to vector<2x8x8xf32>
    %318 = arith.mulf %313, %317 : vector<2x8x8xf32>
    "tpu.trace_start"() <{level = 10 : i32, message = "bqk,bke->bqe"}> : () -> ()
    %cst_177 = arith.constant dense<0.000000e+00> : vector<2x8x8xf32>
    %319 = tpu.matmul %318, %307, %cst_177 {dimension_numbers = #tpu.dot_dimension_numbers<[2], [1], [1], [2], [0, 0, 0, 1, 1, 2], [0], [0]>} : vector<2x8x8xf32>, vector<2x8x8xf32>, vector<2x8x8xf32> -> vector<2x8x8xf32>
    "tpu.trace_stop"() : () -> ()
    %320 = vector.shape_cast %319 : vector<2x8x8xf32> to vector<16x8xf32>
    %c24_178 = arith.constant 24 : index
    %c0_179 = arith.constant 0 : index
    %321 = vector.load %arg9[%c24_178, %c0_179] : memref<32x32xf32, #tpu.memory_space<vmem>>, vector<8x32xf32>
    %cst_180 = arith.constant dense<0.000000e+00> : vector<16x32xf32>
    %322 = tpu.matmul %320, %321, %cst_180 {dimension_numbers = #tpu.dot_dimension_numbers<[1], [0], [0], [1], [0, 0, 1, 1], [], []>} : vector<16x8xf32>, vector<8x32xf32>, vector<16x32xf32> -> vector<16x32xf32>
    %323 = arith.addf %295, %322 : vector<16x32xf32>
    %324 = arith.addf %159, %323 : vector<16x32xf32>
    %325 = vector.shape_cast %324 : vector<16x32xf32> to vector<2x8x32xf32>
    %cst_181 = arith.constant dense<0.000000e+00> : vector<2x8xf32>
    %326 = vector.multi_reduction <add>, %325, %cst_181 [2] : vector<2x8x32xf32> to vector<2x8xf32>
    %327 = vector.shape_cast %326 : vector<2x8xf32> to vector<2x8x1xf32>
    %cst_182 = arith.constant 3.200000e+01 : f32
    %328 = vector.broadcast %cst_182 : f32 to vector<2x8x1xf32>
    %329 = arith.divf %327, %328 : vector<2x8x1xf32>
    %cst_183 = arith.constant dense<0.000000e+00> : vector<2x1xf32>
    %330 = vector.multi_reduction <add>, %329, %cst_183 [1] : vector<2x8x1xf32> to vector<2x1xf32>
    %331 = vector.shape_cast %330 : vector<2x1xf32> to vector<2x1x1xf32>
    %cst_184 = arith.constant 8.000000e+00 : f32
    %332 = vector.broadcast %cst_184 : f32 to vector<2x1x1xf32>
    %333 = arith.divf %331, %332 : vector<2x1x1xf32>
    %334 = vector.broadcast %333 : vector<2x1x1xf32> to vector<2x8x32xf32>
    %335 = arith.subf %325, %334 : vector<2x8x32xf32>
    %336 = arith.mulf %335, %335 : vector<2x8x32xf32>
    %cst_185 = arith.constant dense<0.000000e+00> : vector<2x8xf32>
    %337 = vector.multi_reduction <add>, %336, %cst_185 [2] : vector<2x8x32xf32> to vector<2x8xf32>
    %338 = vector.shape_cast %337 : vector<2x8xf32> to vector<2x8x1xf32>
    %cst_186 = arith.constant 3.200000e+01 : f32
    %339 = vector.broadcast %cst_186 : f32 to vector<2x8x1xf32>
    %340 = arith.divf %338, %339 : vector<2x8x1xf32>
    %cst_187 = arith.constant dense<0.000000e+00> : vector<2x1xf32>
    %341 = vector.multi_reduction <add>, %340, %cst_187 [1] : vector<2x8x1xf32> to vector<2x1xf32>
    %342 = vector.shape_cast %341 : vector<2x1xf32> to vector<2x1x1xf32>
    %cst_188 = arith.constant 8.000000e+00 : f32
    %343 = vector.broadcast %cst_188 : f32 to vector<2x1x1xf32>
    %344 = arith.divf %342, %343 : vector<2x1x1xf32>
    %cst_189 = arith.constant 9.99999974E-6 : f32
    %345 = vector.broadcast %cst_189 : f32 to vector<2x1x1xf32>
    %346 = arith.addf %344, %345 : vector<2x1x1xf32>
    %347 = math.rsqrt %346 : vector<2x1x1xf32>
    %348 = vector.broadcast %347 : vector<2x1x1xf32> to vector<2x8x32xf32>
    %349 = arith.mulf %335, %348 : vector<2x8x32xf32>
    %350 = vector.shape_cast %349 : vector<2x8x32xf32> to vector<16x32xf32>
    %c0_190 = arith.constant 0 : index
    %c0_191 = arith.constant 0 : index
    %351 = vector.load %arg10[%c0_190, %c0_191] : memref<32x64xf32, #tpu.memory_space<vmem>>, vector<32x64xf32>
    %cst_192 = arith.constant dense<0.000000e+00> : vector<16x64xf32>
    %352 = tpu.matmul %350, %351, %cst_192 {dimension_numbers = #tpu.dot_dimension_numbers<[1], [0], [0], [1], [0, 0, 1, 1], [], []>} : vector<16x32xf32>, vector<32x64xf32>, vector<16x64xf32> -> vector<16x64xf32>
    %c0_193 = arith.constant 0 : index
    %c0_194 = arith.constant 0 : index
    %353 = vector.load %arg11[%c0_193, %c0_194] : memref<1x64xf32, #tpu.memory_space<vmem>>, vector<1x64xf32>
    %354 = vector.broadcast %353 : vector<1x64xf32> to vector<16x64xf32>
    %355 = arith.addf %352, %354 : vector<16x64xf32>
    %cst_195 = arith.constant 0.000000e+00 : f32
    %356 = vector.broadcast %cst_195 : f32 to vector<16x64xf32>
    %357 = arith.maximumf %355, %356 : vector<16x64xf32>
    %c0_196 = arith.constant 0 : index
    %c0_197 = arith.constant 0 : index
    %358 = vector.load %arg12[%c0_196, %c0_197] : memref<64x32xf32, #tpu.memory_space<vmem>>, vector<64x32xf32>
    %cst_198 = arith.constant dense<0.000000e+00> : vector<16x32xf32>
    %359 = tpu.matmul %357, %358, %cst_198 {dimension_numbers = #tpu.dot_dimension_numbers<[1], [0], [0], [1], [0, 0, 1, 1], [], []>} : vector<16x64xf32>, vector<64x32xf32>, vector<16x32xf32> -> vector<16x32xf32>
    %c0_199 = arith.constant 0 : index
    %c0_200 = arith.constant 0 : index
    %360 = vector.load %arg13[%c0_199, %c0_200] : memref<1x32xf32, #tpu.memory_space<vmem>>, vector<1x32xf32>
    %361 = vector.broadcast %360 : vector<1x32xf32> to vector<16x32xf32>
    %362 = arith.addf %359, %361 : vector<16x32xf32>
    %363 = arith.addf %324, %362 : vector<16x32xf32>
    %c0_201 = arith.constant 0 : index
    %c0_202 = arith.constant 0 : index
    %364 = vector.load %arg14[%c0_201, %c0_202] : memref<16x32xf32, #tpu.memory_space<vmem>>, vector<16x32xf32>
    tpu.vector_store %arg14[%c0_201, %c0_202], %363 {strides = array<i32>} : memref<16x32xf32, #tpu.memory_space<vmem>>, vector<16x32xf32>,
    return
  }
}

</mosaic_0001>

<bundles_post_ra>
// kernel: tpu_custom_call.1
= control target key start
LH: loop header
LB: loop body
LE: loop exit
PB: predicated region body
PF: predicated region fallthrough
CT: control target
= control target key end

     0   :  { %vm58_vm0 = vcmask 261120   ;;  %s7764_s0 = inlined_call_operand.vmem [shape: f32[2,8,32], index: 0, kind: input, shape index: {}]   ;;  %s7765_s1 = inlined_call_operand.vmem [shape: f32[2,8,32], index: 1, kind: input, shape index: {}]   ;;  %s7766_s2 = inlined_call_operand.vmem [shape: f32[4,32,8], index: 2, kind: input, shape index: {}]   ;;  %s7767_s3 = inlined_call_operand.vmem [shape: f32[4,32,8], index: 3, kind: input, shape index: {}]   ;;  %s7768_s4 = inlined_call_operand.vmem [shape: f32[4,32,8], index: 4, kind: input, shape index: {}]   ;;  %s7769_s5 = inlined_call_operand.vmem [shape: f32[32,32], index: 5, kind: input, shape index: {}]   ;;  %s7770_s6 = inlined_call_operand.vmem [shape: f32[4,32,8], index: 6, kind: input, shape index: {}]   ;;  %s7771_s7 = inlined_call_operand.vmem [shape: f32[4,32,8], index: 7, kind: input, shape index: {}]   ;;  %s7772_s8 = inlined_call_operand.vmem [shape: f32[4,32,8], index: 8, kind: input, shape index: {}]   ;;  %s7773_s9 = inlined_call_operand.vmem [shape: f32[32,32], index: 9, kind: input, shape index: {}]   ;;  %s7774_s10 = inlined_call_operand.vmem [shape: f32[32,64], index: 10, kind: input, shape index: {}]   ;;  %s7775_s11 = inlined_call_operand.vmem [shape: f32[1,64], index: 11, kind: input, shape index: {}]   ;;  %s7776_s12 = inlined_call_operand.vmem [shape: f32[64,32], index: 12, kind: input, shape index: {}]   ;;  %s7777_s13 = inlined_call_operand.vmem [shape: f32[1,32], index: 13, kind: input, shape index: {}]   ;;  %s7778_s14 = inlined_call_operand.hbm [shape: f32[16,32], index: 14, kind: output, shape index: {}]  }
   0x1   :  { %v7001_v0 = vld [vmem:[%s7765_s1] sm:$0xff]  ;;  %v7006_v1 = vld [vmem:[%s7765_s1 + $0x8] sm:$0xff] }
   0x2   :  { %19 = vsyncpa [#allocation3], 0  ;;  %v59_v2 = vsel %vm58_vm0, %v7001_v0, 0.0  ;;  %v62_v3 = vsel %vm58_vm0, %v7006_v1, 0.0  ;;  %v115_v28 = vld [vmem:[%s7766_s2] sm:$0xff]  ;;  %v116_v29 = vld [vmem:[%s7766_s2 + $0x8] sm:$0xff] }
   0x3   :  { %60 = vadd.xlane.f32.xlu0 %v59_v2  ;;  %v6581_v30 = vpack.c.bf16 %v116_v29, %v115_v28  ;;  %v279_v31 = vld [vmem:[%s7768_s4] sm:$0xff]  ;;  %v280_v32 = vld [vmem:[%s7768_s4 + $0x8] sm:$0xff]  ;;  %v117_v34 = vld [vmem:[%s7766_s2 + $0x10] sm:$0xff]  ;;  %vm6919_vm1 = vmmov 0   ;;  %vm358_vm2 = vcmask 64512   ;;  %vm5547_vm4 = vcmask 523264  }
   0x4   :  { %v6597_v33 = vpack.c.bf16 %v280_v32, %v279_v31  ;;  %v118_v35 = vld [vmem:[%s7766_s2 + $0x18] sm:$0xff]  ;;  %v281_v37 = vld [vmem:[%s7768_s4 + $0x10] sm:$0xff]  ;;  %v200_v40 = vld [vmem:[%s7767_s3] sm:$0xff] }
   0x5   :  { %6582 = vmatprep.subr.bf16.mxu1 %v6581_v30  ;;  %v6585_v36 = vpack.c.bf16 %v118_v35, %v117_v34  ;;  %v282_v38 = vld [vmem:[%s7768_s4 + $0x18] sm:$0xff]  ;;  %v201_v41 = vld [vmem:[%s7767_s3 + $0x8] sm:$0xff] }
   0x6   :  { %6584 = vmatpush3.bf16.msra.mxu1 %v6581_v30  ;;  %6598 = vmatprep.subr.bf16.mxu0 %v6597_v33  ;;  %v6601_v39 = vpack.c.bf16 %v282_v38, %v281_v37  ;;  %v6589_v42 = vpack.c.bf16 %v201_v41, %v200_v40  ;;  %v5661_v37 = vld [vmem:[%s7766_s2 + $0x20] sm:$0xff]  ;;  %v5662_v38 = vld [vmem:[%s7766_s2 + $0x28] sm:$0xff] }
   0x7   :  { %63 = vadd.xlane.f32.xlu0 %v62_v3  ;;  %6600 = vmatpush3.bf16.msra.mxu0 %v6597_v33  ;;  %v202_v3 = vld [vmem:[%s7767_s3 + $0x10] sm:$0xff]  ;;  %v5667_v40 = vld [vmem:[%s7767_s3 + $0x20] sm:$0xff]  ;;  %v5668_v41 = vld [vmem:[%s7767_s3 + $0x28] sm:$0xff] }
   0x8   :  { %6586 = vmatprep.subr.bf16.mxu1 %v6585_v36  ;;  %6602 = vmatprep.subr.bf16.mxu0 %v6601_v39 }
   0xa   :  { %6588 = vmatpush3.bf16.msra.mxu1 %v6585_v36 }
   0xb   :  { %6604 = vmatpush3.bf16.msra.mxu0 %v6601_v39  ;;  %6590 = vmatprep.subr.bf16.mxu1 %v6589_v42  ;;  %v6605_v39 = vpack.c.bf16 %v5662_v38, %v5661_v37  ;;  %v5691_v38 = vld [vmem:[%s7766_s2 + $0x50] sm:$0xff] }
  0x90   :  { %v61_v4 = vpop.xlane.xlu0 %60 }
  0x91   :  { %v66_v5 = vmul.f32 0.03125, %v61_v4  ;;  %v203_v4 = vld [vmem:[%s7767_s3 + $0x18] sm:$0xff] }
  0x93   :  { %v68_v6 = vrot.slane %v66_v5, 4 }
  0x94   :  { %v64_v7 = vpop.xlane.xlu0 %63 }
  0x95   :  { %v69_v8 = vadd.f32 %v68_v6, %v66_v5  ;;  %v67_v9 = vmul.f32 0.03125, %v64_v7  ;;  %v6593_v7 = vpack.c.bf16 %v203_v4, %v202_v3 }
  0x97   :  { %v70_v10 = vrot.slane %v69_v8, 2  ;;  %v74_v11 = vrot.slane %v67_v9, 4 }
  0x99   :  { %v71_v12 = vadd.f32 %v70_v10, %v69_v8  ;;  %v75_v13 = vadd.f32 %v74_v11, %v67_v9  ;;  %v6918_v8 = vmov 0.0  }
  0x9a   :  { %6130 = vmatprep.subr.mxu0 %v6918_v8 }
  0x9b   :  { %v72_v14 = vrot.slane %v71_v12, 1  ;;  %v76_v15 = vrot.slane %v75_v13, 2 }
  0x9d   :  { %v77_v16 = vadd.f32 %v76_v15, %v75_v13  ;;  %v73_v17 = vadd.f32 %v72_v14, %v71_v12  ;;  %v52_v15 = vlaneseq }
  0x9f   :  { %v78_v18 = vrot.slane %v77_v16, 1  ;;  %v81_v19 = vmul.f32 0.125, %v73_v17  ;;  %v55_v17 = vand.u32 127, %v52_v15 }
  0xa1   :  { %v79_v20 = vadd.f32 %v78_v18, %v77_v16  ;;  %v83_v21 = vsub.f32 %v7001_v0, %v81_v19  ;;  %v53_v16 = vshrl.u32 %v52_v15, 7 }
  0xa3   :  { %v85_v22 = vmul.f32 %v83_v21, %v83_v21  ;;  %v82_v23 = vmul.f32 0.125, %v79_v20  ;;  %vm56_vm3 = vcmp.gt.s32.totalorder %v55_v17, %v53_v16 }
  0xa4   :  { %v7085_v18 = vsel %vm56_vm3, -1e+30, %v6918_v8 }
  0xa5   :  { %v87_v24 = vsel %vm58_vm0, %v85_v22, 0.0  ;;  %v84_v25 = vsub.f32 %v7006_v1, %v82_v23 }
  0xa6   :  { %88 = vadd.xlane.f32.xlu1 %v87_v24 }
  0xa7   :  { %v86_v26 = vmul.f32 %v84_v25, %v84_v25 }
  0xa9   :  { %v90_v27 = vsel %vm58_vm0, %v86_v26, 0.0 }
  0xaa   :  { %91 = vadd.xlane.f32.xlu1 %v90_v27 }
 0x133   :  { %v89_v43 = vpop.xlane.xlu1 %88 }
 0x134   :  { %v93_v44 = vmul.f32 0.03125, %v89_v43 }
 0x136   :  { %v95_v45 = vrot.slane %v93_v44, 4 }
 0x137   :  { %v92_v46 = vpop.xlane.xlu1 %91 }
 0x138   :  { %v96_v47 = vadd.f32 %v95_v45, %v93_v44  ;;  %v94_v48 = vmul.f32 0.03125, %v92_v46  ;;  %v5663_v45 = vld [vmem:[%s7766_s2 + $0x30] sm:$0xff]  ;;  %v5664_v46 = vld [vmem:[%s7766_s2 + $0x38] sm:$0xff] }
 0x13a   :  { %v97_v49 = vrot.slane %v96_v47, 2  ;;  %v101_v50 = vrot.slane %v94_v48, 4 }
 0x13c   :  { %v98_v51 = vadd.f32 %v97_v49, %v96_v47  ;;  %v102_v52 = vadd.f32 %v101_v50, %v94_v48  ;;  %v6609_v49 = vpack.c.bf16 %v5664_v46, %v5663_v45  ;;  %v5669_v50 = vld [vmem:[%s7767_s3 + $0x30] sm:$0xff] }
 0x13d   :  { %v5703_v46 = vld [vmem:[%s7768_s4 + $0x50] sm:$0xff] }
 0x13e   :  { %v99_v53 = vrot.slane %v98_v51, 1  ;;  %v103_v54 = vrot.slane %v102_v52, 2 }
 0x140   :  { %v100_v55 = vadd.f32 %v99_v53, %v98_v51  ;;  %v104_v56 = vadd.f32 %v103_v54, %v102_v52  ;;  %v5670_v51 = vld [vmem:[%s7767_s3 + $0x38] sm:$0xff]  ;;  %v5673_v52 = vld [vmem:[%s7768_s4 + $0x20] sm:$0xff]  ;;  %v5674_v53 = vld [vmem:[%s7768_s4 + $0x28] sm:$0xff] }
 0x142   :  { %v107_v57 = vmul.f32 0.125, %v100_v55  ;;  %v105_v58 = vrot.slane %v104_v56, 1 }
 0x144   :  { %v109_v59 = vadd.f32 1e-05, %v107_v57  ;;  %v106_v60 = vadd.f32 %v105_v58, %v104_v56  ;;  %v6617_v56 = vpack.c.bf16 %v5670_v51, %v5669_v50  ;;  %v6621_v57 = vpack.c.bf16 %v5674_v53, %v5673_v52  ;;  %v5675_v58 = vld [vmem:[%s7768_s4 + $0x30] sm:$0xff]  ;;  %v679_v50 = vld [vmem:[%s7769_s5] sm:$0xff]  ;;  %v5696_v53 = vld [vmem:[%s7767_s3 + $0x48] sm:$0xff] }
 0x145   :  { %v5695_v52 = vld [vmem:[%s7767_s3 + $0x40] sm:$0xff] }
 0x146   :  { %6814 = vrsqrt.f32 %v109_v59  ;;  %v108_v61 = vmul.f32 0.125, %v106_v60  ;;  %v5676_v59 = vld [vmem:[%s7768_s4 + $0x38] sm:$0xff] }
 0x147   :  { %v6625_v60 = vpack.c.bf16 %v5676_v59, %v5675_v58  ;;  %v5697_v58 = vld [vmem:[%s7767_s3 + $0x50] sm:$0xff]  ;;  %v5698_v59 = vld [vmem:[%s7767_s3 + $0x58] sm:$0xff] }
 0x148   :  { %v110_v62 = vadd.f32 1e-05, %v108_v61 }
 0x14a   :  { %6816 = vrsqrt.f32 %v110_v62 }
 0x150   :  { %v6815_v63 = vpop.eup %6814 }
 0x151   :  { %v7046_v2 = vmul.f32 %v6815_v63, %v83_v21 }
 0x153   :  { %6095 = vmatprep.mubr.msk.f32.mxu1 %vm58_vm0, %v7046_v2  ;;  %6117 = vmatprep.mubr.msk.f32.mxu0 %vm58_vm0, %v7046_v2 }
 0x154   :  { %v6817_v5 = vpop.eup %6816 }
 0x155   :  { %v7058_v6 = vmul.f32 %v6817_v5, %v84_v25 }
 0x157   :  { %6096 = vmatmul.mubr.msk.f32.vlgmr.msra.gmra.mrb[0].mxu1 %vm58_vm0, %v7058_v6  ;;  %6118 = vmatmul.mubr.msk.f32.vlgmr.msra.gmra.mrb[0].mxu0 %vm58_vm0, %v7058_v6 }
 0x158   :  { %6592 = vmatpush3.bf16.msra.mxu1 %v6589_v42  ;;  %6106 = vmatprep.mubr.msk.f32.mxu1 %vm58_vm0, %v7046_v2  ;;  %v6613_v42 = vpack.c.bf16 %v5668_v41, %v5667_v40 }
 0x159   :  { %6594 = vmatprep.subr.bf16.mxu1 %v6593_v7  ;;  %6132 = vmatprep.mubr.msk.f32.mxu0 %vm6919_vm1, %v6918_v8 }
 0x15c   :  { %6596 = vmatpush3.bf16.msra.mxu1 %v6593_v7 }
 0x15d   :  { %6120 = vmatprep.subr.mxu1 %v6918_v8 }
 0x15f   :  { %6107 = vmatmul.mubr.msk.f32.vlgmr.msra.gmra.mrb[2].mxu1 %vm58_vm0, %v7058_v6 }
 0x160   :  { %6122 = vmatprep.mubr.msk.f32.mxu1 %vm6919_vm1, %v6918_v8 }
 0x22a   :  { %v6097_v9 = vpop.f32.mrb[0].mxu1  ;;  %v6119_v10 = vpop.f32.mrb[0].mxu0 }
 0x22b   :  { %v191_v11 = vpop.f32.mrb[1].mxu1  ;;  %v349_v12 = vpop.f32.mrb[1].mxu0 }
 0x22c   :  { %6131 = vmatpush3.msra.mxu0 %v349_v12 }
 0x22d   :  { %6606 = vmatprep.subr.bf16.mxu0 %v6605_v39 }
 0x232   :  { %v6108_v13 = vpop.f32.mrb[2].mxu1 }
 0x233   :  { %v270_v14 = vpop.f32.mrb[3].mxu1 }
 0x234   :  { %6121 = vmatpush3.xpose.msk.msra.mxu1 %vm358_vm2, %v270_v14 }
 0x235   :  { %6125 = vmatprep.subr.mxu1 %v6918_v8 }
 0x237   :  { %6123 = vmatmul.mubr.msk.f32.vlgmr.msra.gmra.mrb[4].mxu1 %vm358_vm2, %v191_v11 }
 0x238   :  { %6126 = vmatpush3.xpose.msk.msra.mxu1 %vm358_vm2, %v6108_v13  ;;  %6127 = vmatprep.mubr.msk.f32.mxu1 %vm6919_vm1, %v6918_v8 }
 0x239   :  { %6135 = vmatprep.subr.mxu1 %v6918_v8 }
 0x23b   :  { %6128 = vmatmul.mubr.msk.f32.vlgmr.msra.gmra.mrb[6].mxu1 %vm358_vm2, %v6097_v9 }
 0x23c   :  { %6136 = vmatpush3.msra.mxu1 %v6119_v10  ;;  %6137 = vmatprep.mubr.msk.f32.mxu1 %vm6919_vm1, %v6918_v8 }
 0x23d   :  { %6614 = vmatprep.subr.bf16.mxu1 %v6613_v42 }
 0x30a   :  { %v431_v19 = vpop.f32.mrb[4].mxu1 }
 0x30b   :  { %v432_v20 = vadd.f32 %v431_v19, %v7085_v18  ;;  %v6124_v21 = vpop.f32.mrb[5].mxu1 }
 0x30d   :  { %v511_v22 = vsel %vm358_vm2, %v432_v20, -inf }
 0x30e   :  { %512 = vmax.xlane.f32.xlu1 %v511_v22  ;;  %v507_v23 = vpop.f32.mrb[6].mxu1 }
 0x30f   :  { %v508_v24 = vadd.f32 %v507_v23, %v7085_v18  ;;  %v6129_v25 = vpop.f32.mrb[7].mxu1 }
 0x311   :  { %v514_v26 = vsel %vm358_vm2, %v508_v24, -inf }
 0x312   :  { %515 = vmax.xlane.f32.xlu0 %v514_v26 }
 0x39b   :  { %v513_v27 = vpop.xlane.xlu1 %512 }
 0x39c   :  { %v517_v28 = vsub.f32 %v432_v20, %v513_v27 }
 0x39e   :  { %v519_v29 = vmul.f32 1.442695, %v517_v28 }
 0x39f   :  { %v516_v30 = vpop.xlane.xlu0 %515 }
 0x3a0   :  { %6818 = vpow2.f32 %v519_v29  ;;  %v518_v31 = vsub.f32 %v508_v24, %v516_v30 }
 0x3a2   :  { %v521_v32 = vmul.f32 1.442695, %v518_v31  ;;  %v5689_v31 = vld [vmem:[%s7766_s2 + $0x40] sm:$0xff] }
 0x3a4   :  { %6820 = vpow2.f32 %v521_v32  ;;  %v5690_v32 = vld [vmem:[%s7766_s2 + $0x48] sm:$0xff] }
 0x3aa   :  { %v6819_v33 = vpop.eup %6818 }
 0x3ab   :  { %v523_v34 = vsel %vm358_vm2, %v6819_v33, 0.0 }
 0x3ac   :  { %524 = vadd.xlane.f32.xlu1 %v523_v34 }
 0x3ae   :  { %v6821_v35 = vpop.eup %6820 }
 0x3af   :  { %v526_v36 = vsel %vm358_vm2, %v6821_v35, 0.0 }
 0x3b0   :  { %527 = vadd.xlane.f32.xlu0 %v526_v36 }
 0x439   :  { %v525_v43 = vpop.xlane.xlu1 %524 }
 0x43a   :  { %6822 = vrcp.f32 %v525_v43  ;;  %v5701_v43 = vld [vmem:[%s7768_s4 + $0x40] sm:$0xff] }
 0x43d   :  { %v528_v44 = vpop.xlane.xlu0 %527 }
 0x43e   :  { %6824 = vrcp.f32 %v528_v44  ;;  %v5702_v44 = vld [vmem:[%s7768_s4 + $0x48] sm:$0xff] }
 0x43f   :  { %v6645_v45 = vpack.c.bf16 %v5702_v44, %v5701_v43  ;;  %v5729_v43 = vld [vmem:[%s7768_s4 + $0x70] sm:$0xff]  ;;  %v5730_v44 = vld [vmem:[%s7768_s4 + $0x78] sm:$0xff] }
 0x444   :  { %v6823_v47 = vpop.eup %6822 }
 0x445   :  { %v531_v48 = vmul.f32 %v6823_v47, %v6819_v33  ;;  %v6629_v33 = vpack.c.bf16 %v5690_v32, %v5689_v31  ;;  %v5704_v47 = vld [vmem:[%s7768_s4 + $0x58] sm:$0xff] }
 0x447   :  { %6133 = vmatmul.mubr.msk.f32.vlgmr.msra.gmra.mrb[2].mxu0 %vm358_vm2, %v531_v48  ;;  %v6649_v48 = vpack.c.bf16 %v5704_v47, %v5703_v46  ;;  %v5721_v46 = vld [vmem:[%s7767_s3 + $0x60] sm:$0xff]  ;;  %v5722_v47 = vld [vmem:[%s7767_s3 + $0x68] sm:$0xff] }
 0x448   :  { %v6825_v54 = vpop.eup %6824  ;;  %6608 = vmatpush3.bf16.msra.mxu0 %v6605_v39  ;;  %6148 = vmatprep.mubr.msk.f32.mxu0 %vm58_vm0, %v7046_v2  ;;  %v5692_v39 = vld [vmem:[%s7766_s2 + $0x58] sm:$0xff] }
 0x449   :  { %v532_v55 = vmul.f32 %v6825_v54, %v6821_v35  ;;  %6610 = vmatprep.subr.bf16.mxu0 %v6609_v49 }
 0x44b   :  { %6138 = vmatmul.mubr.msk.f32.vlgmr.msra.gmra.mrb[8].mxu1 %vm358_vm2, %v532_v55  ;;  %v6637_v55 = vpack.c.bf16 %v5696_v53, %v5695_v52 }
 0x44c   :  { %6612 = vmatpush3.bf16.msra.mxu0 %v6609_v49  ;;  %6616 = vmatpush3.bf16.msra.mxu1 %v6613_v42  ;;  %v6633_v42 = vpack.c.bf16 %v5692_v39, %v5691_v38  ;;  %v1240_v49 = vld [vmem:[%s7769_s5 + $0x8] sm:$0xff] }
 0x44d   :  { %6159 = vmatprep.mubr.msk.f32.mxu1 %vm58_vm0, %v7046_v2  ;;  %6618 = vmatprep.subr.bf16.mxu1 %v6617_v56 }
 0x44e   :  { %6622 = vmatprep.subr.bf16.mxu0 %v6621_v57 }
 0x44f   :  { %6149 = vmatmul.mubr.msk.f32.vlgmr.msra.gmra.mrb[4].mxu0 %vm58_vm0, %v7058_v6 }
 0x450   :  { %6620 = vmatpush3.bf16.msra.mxu1 %v6617_v56  ;;  %6624 = vmatpush3.bf16.msra.mxu0 %v6621_v57 }
 0x451   :  { %6170 = vmatprep.mubr.msk.f32.mxu0 %vm58_vm0, %v7046_v2  ;;  %6626 = vmatprep.subr.bf16.mxu0 %v6625_v60 }
 0x452   :  { %6173 = vmatprep.subr.mxu1 %v6918_v8 }
 0x453   :  { %6160 = vmatmul.mubr.msk.f32.vlgmr.msra.gmra.mrb[10].mxu1 %vm58_vm0, %v7058_v6 }
 0x454   :  { %6628 = vmatpush3.bf16.msra.mxu0 %v6625_v60  ;;  %6175 = vmatprep.mubr.msk.f32.mxu1 %vm6919_vm1, %v6918_v8  ;;  %v6641_v60 = vpack.c.bf16 %v5698_v59, %v5697_v58 }
 0x455   :  { %6183 = vmatprep.subr.mxu0 %v6918_v8 }
 0x457   :  { %6171 = vmatmul.mubr.msk.f32.vlgmr.msra.gmra.mrb[6].mxu0 %vm58_vm0, %v7058_v6 }
 0x458   :  { %6185 = vmatprep.mubr.msk.f32.mxu0 %vm6919_vm1, %v6918_v8 }
 0x51a   :  { %v7149_v61 = vpop.f32.mrb[2].mxu0 }
 0x51b   :  { %v6134_v62 = vpop.f32.mrb[3].mxu0 }
 0x51e   :  { %v7151_v63 = vpop.f32.mrb[8].mxu1 }
 0x51f   :  { %v6139_v3 = vpop.f32.mrb[9].mxu1 }
 0x522   :  { %v6150_v4 = vpop.f32.mrb[4].mxu0 }
 0x523   :  { %v751_v5 = vpop.f32.mrb[5].mxu0 }
 0x526   :  { %v6161_v7 = vpop.f32.mrb[10].mxu1 }
 0x527   :  { %v831_v9 = vpop.f32.mrb[11].mxu1 }
 0x528   :  { %6174 = vmatpush3.xpose.msk.msra.mxu1 %vm358_vm2, %v831_v9 }
 0x529   :  { %6178 = vmatprep.subr.mxu1 %v6918_v8 }
 0x52a   :  { %v6172_v10 = vpop.f32.mrb[6].mxu0 }
 0x52b   :  { %v911_v11 = vpop.f32.mrb[7].mxu0  ;;  %6176 = vmatmul.mubr.msk.f32.vlgmr.msra.gmra.mrb[12].mxu1 %vm358_vm2, %v751_v5 }
 0x52c   :  { %6179 = vmatpush3.xpose.msk.msra.mxu1 %vm358_vm2, %v6161_v7  ;;  %6184 = vmatpush3.msra.mxu0 %v911_v11 }
 0x52d   :  { %6180 = vmatprep.mubr.msk.f32.mxu1 %vm6919_vm1, %v6918_v8  ;;  %6188 = vmatprep.subr.mxu1 %v6918_v8 }
 0x52e   :  { %6193 = vmatprep.subr.mxu0 %v1240_v49 }
 0x52f   :  { %6181 = vmatmul.mubr.msk.f32.vlgmr.msra.gmra.mrb[14].mxu1 %vm358_vm2, %v6150_v4 }
 0x530   :  { %6189 = vmatpush3.msra.mxu1 %v6172_v10  ;;  %6190 = vmatprep.mubr.msk.f32.mxu1 %vm6919_vm1, %v6918_v8 }
 0x531   :  { %6630 = vmatprep.subr.bf16.mxu1 %v6629_v33 }
 0x5fe   :  { %v992_v12 = vpop.f32.mrb[12].mxu1 }
 0x5ff   :  { %v993_v13 = vadd.f32 %v992_v12, %v7085_v18  ;;  %v6177_v14 = vpop.f32.mrb[13].mxu1 }
 0x601   :  { %v1072_v15 = vsel %vm358_vm2, %v993_v13, -inf }
 0x602   :  { %1073 = vmax.xlane.f32.xlu0 %v1072_v15  ;;  %v1068_v16 = vpop.f32.mrb[14].mxu1 }
 0x603   :  { %v1069_v17 = vadd.f32 %v1068_v16, %v7085_v18  ;;  %v6182_v19 = vpop.f32.mrb[15].mxu1 }
 0x605   :  { %v1075_v20 = vsel %vm358_vm2, %v1069_v17, -inf }
 0x606   :  { %1076 = vmax.xlane.f32.xlu1 %v1075_v20 }
 0x68f   :  { %v1074_v21 = vpop.xlane.xlu0 %1073 }
 0x690   :  { %v1078_v22 = vsub.f32 %v993_v13, %v1074_v21 }
 0x692   :  { %v1080_v23 = vmul.f32 1.442695, %v1078_v22 }
 0x693   :  { %v1077_v24 = vpop.xlane.xlu1 %1076 }
 0x694   :  { %6826 = vpow2.f32 %v1080_v23  ;;  %v1079_v25 = vsub.f32 %v1069_v17, %v1077_v24 }
 0x696   :  { %v1082_v26 = vmul.f32 1.442695, %v1079_v25 }
 0x698   :  { %6828 = vpow2.f32 %v1082_v26 }
 0x69e   :  { %v6827_v27 = vpop.eup %6826 }
 0x69f   :  { %v1084_v28 = vsel %vm358_vm2, %v6827_v27, 0.0 }
 0x6a0   :  { %1085 = vadd.xlane.f32.xlu0 %v1084_v28  ;;  %v5716_v28 = vld [vmem:[%s7766_s2 + $0x68] sm:$0xff] }
 0x6a2   :  { %v6829_v29 = vpop.eup %6828 }
 0x6a3   :  { %v1087_v30 = vsel %vm358_vm2, %v6829_v29, 0.0 }
 0x6a4   :  { %1088 = vadd.xlane.f32.xlu1 %v1087_v30  ;;  %v1963_v30 = vld [vmem:[%s7769_s5 + $0x10] sm:$0xff] }
 0x72d   :  { %v1086_v34 = vpop.xlane.xlu0 %1085 }
 0x72e   :  { %6830 = vrcp.f32 %v1086_v34  ;;  %v5718_v34 = vld [vmem:[%s7766_s2 + $0x78] sm:$0xff] }
 0x731   :  { %v1089_v35 = vpop.xlane.xlu1 %1088 }
 0x732   :  { %6832 = vrcp.f32 %v1089_v35 }
 0x738   :  { %v6831_v36 = vpop.eup %6830 }
 0x739   :  { %v1092_v37 = vmul.f32 %v6831_v36, %v6827_v27  ;;  %v5715_v27 = vld [vmem:[%s7766_s2 + $0x60] sm:$0xff] }
 0x73b   :  { %6186 = vmatmul.mubr.msk.f32.vlgmr.msra.gmra.mrb[8].mxu0 %vm358_vm2, %v1092_v37 }
 0x73c   :  { %v6833_v40 = vpop.eup %6832  ;;  %6194 = vmatpush3.msra.mxu0 %v1240_v49  ;;  %v5723_v49 = vld [vmem:[%s7767_s3 + $0x70] sm:$0xff] }
 0x73d   :  { %v1093_v41 = vmul.f32 %v6833_v40, %v6829_v29  ;;  %6198 = vmatprep.subr.mxu0 %v679_v50  ;;  %v6653_v29 = vpack.c.bf16 %v5716_v28, %v5715_v27  ;;  %v5727_v40 = vld [vmem:[%s7768_s4 + $0x60] sm:$0xff] }
 0x73e   :  { %v48_v27 = vld [vmem:[%s7764_s0] sm:$0xff] }
 0x73f   :  { %6191 = vmatmul.mubr.msk.f32.vlgmr.msra.gmra.mrb[16].mxu1 %vm358_vm2, %v1093_v41  ;;  %v5728_v41 = vld [vmem:[%s7768_s4 + $0x68] sm:$0xff] }
 0x740   :  { %6632 = vmatpush3.bf16.msra.mxu1 %v6629_v33  ;;  %6211 = vmatprep.mubr.msk.f32.mxu1 %vm58_vm0, %v7046_v2  ;;  %v5717_v33 = vld [vmem:[%s7766_s2 + $0x70] sm:$0xff] }
 0x741   :  { %6634 = vmatprep.subr.bf16.mxu1 %v6633_v42  ;;  %v6657_v38 = vpack.c.bf16 %v5718_v34, %v5717_v33 }
 0x744   :  { %6636 = vmatpush3.bf16.msra.mxu1 %v6633_v42  ;;  %v6669_v42 = vpack.c.bf16 %v5728_v41, %v5727_v40 }
 0x745   :  { %6646 = vmatprep.subr.bf16.mxu1 %v6645_v45 }
 0x747   :  { %6212 = vmatmul.mubr.msk.f32.vlgmr.msra.gmra.mrb[18].mxu1 %vm58_vm0, %v7058_v6 }
 0x748   :  { %6648 = vmatpush3.bf16.msra.mxu1 %v6645_v45  ;;  %6233 = vmatprep.mubr.msk.f32.mxu1 %vm58_vm0, %v7046_v2  ;;  %v6673_v45 = vpack.c.bf16 %v5730_v44, %v5729_v43 }
 0x749   :  { %6650 = vmatprep.subr.bf16.mxu1 %v6649_v48 }
 0x74c   :  { %6652 = vmatpush3.bf16.msra.mxu1 %v6649_v48  ;;  %v6661_v48 = vpack.c.bf16 %v5722_v47, %v5721_v46 }
 0x74d   :  { %6241 = vmatprep.subr.mxu1 %v6918_v8 }
 0x74f   :  { %6234 = vmatmul.mubr.msk.f32.vlgmr.msra.gmra.mrb[20].mxu1 %vm58_vm0, %v7058_v6 }
 0x750   :  { %6243 = vmatprep.mubr.msk.f32.mxu1 %vm6919_vm1, %v6918_v8 }
 0x80e   :  { %v1163_v51 = vpop.f32.mrb[8].mxu0 }
 0x80f   :  { %v6187_v54 = vpop.f32.mrb[9].mxu0  ;;  %6195 = vmatprep.mubr.msk.f32.mxu0 %vm358_vm2, %v1163_v51 }
 0x812   :  { %v1236_v56 = vpop.f32.mrb[16].mxu1 }
 0x813   :  { %v6192_v57 = vpop.f32.mrb[17].mxu1  ;;  %6196 = vmatmul.mubr.msk.f32.vlgmr.msra.gmra.mrb[10].mxu0 %vm358_vm2, %v1236_v56 }
 0x814   :  { %6199 = vmatpush3.msra.mxu0 %v679_v50  ;;  %6200 = vmatprep.mubr.msk.f32.mxu0 %vm358_vm2, %v7149_v61  ;;  %v5724_v50 = vld [vmem:[%s7767_s3 + $0x78] sm:$0xff] }
 0x815   :  { %6638 = vmatprep.subr.bf16.mxu0 %v6637_v55  ;;  %v6665_v54 = vpack.c.bf16 %v5724_v50, %v5723_v49 }
 0x81a   :  { %v6213_v62 = vpop.f32.mrb[18].mxu1 }
 0x81b   :  { %v1474_v3 = vpop.f32.mrb[19].mxu1  ;;  %6201 = vmatmul.mubr.msk.f32.vlgmr.msra.gmra.mrb[10].mxu0 %vm358_vm2, %v7151_v63 }
 0x81c   :  { %6640 = vmatpush3.bf16.msra.mxu0 %v6637_v55  ;;  %6222 = vmatprep.mubr.msk.f32.mxu0 %vm58_vm0, %v7046_v2 }
 0x81d   :  { %6642 = vmatprep.subr.bf16.mxu0 %v6641_v60 }
 0x820   :  { %6644 = vmatpush3.bf16.msra.mxu0 %v6641_v60 }
 0x821   :  { %6236 = vmatprep.subr.mxu0 %v6918_v8 }
 0x822   :  { %v6235_v61 = vpop.f32.mrb[20].mxu1 }
 0x823   :  { %6223 = vmatmul.mubr.msk.f32.vlgmr.msra.gmra.mrb[12].mxu0 %vm58_vm0, %v7058_v6  ;;  %v1634_v4 = vpop.f32.mrb[21].mxu1 }
 0x824   :  { %6238 = vmatprep.mubr.msk.f32.mxu0 %vm6919_vm1, %v6918_v8 }
 0x8f6   :  { %v6224_v5 = vpop.f32.mrb[12].mxu0 }
 0x8f7   :  { %v1554_v7 = vpop.f32.mrb[13].mxu0  ;;  %6242 = vmatpush3.xpose.msk.msra.mxu1 %vm358_vm2, %v6224_v5 }
 0x8f8   :  { %6237 = vmatpush3.xpose.msk.msra.mxu0 %vm358_vm2, %v1554_v7  ;;  %6251 = vmatprep.subr.mxu1 %v6918_v8 }
 0x8f9   :  { %6246 = vmatprep.subr.mxu0 %v6918_v8 }
 0x8fa   :  { %6244 = vmatmul.mubr.msk.f32.vlgmr.msra.gmra.mrb[22].mxu1 %vm358_vm2, %v6213_v62 }
 0x8fb   :  { %6239 = vmatmul.mubr.msk.f32.vlgmr.msra.gmra.mrb[14].mxu0 %vm358_vm2, %v1474_v3  ;;  %6252 = vmatpush3.msra.mxu1 %v6235_v61 }
 0x8fc   :  { %6247 = vmatpush3.msra.mxu0 %v1634_v4  ;;  %6253 = vmatprep.mubr.msk.f32.mxu1 %vm6919_vm1, %v6918_v8 }
 0x8fd   :  { %6248 = vmatprep.mubr.msk.f32.mxu0 %vm6919_vm1, %v6918_v8  ;;  %6654 = vmatprep.subr.bf16.mxu1 %v6653_v29 }
 0x8fe   :  { %6256 = vmatprep.subr.mxu0 %v1963_v30 }
 0x9cd   :  { %v1791_v63 = vpop.f32.mrb[22].mxu1 }
 0x9ce   :  { %v1792_v9 = vadd.f32 %v1791_v63, %v7085_v18  ;;  %v1715_v10 = vpop.f32.mrb[14].mxu0  ;;  %v6245_v11 = vpop.f32.mrb[23].mxu1 }
 0x9cf   :  { %v1716_v12 = vadd.f32 %v1715_v10, %v7085_v18  ;;  %v6240_v13 = vpop.f32.mrb[15].mxu0 }
 0x9d0   :  { %v1798_v14 = vsel %vm358_vm2, %v1792_v9, -inf }
 0x9d1   :  { %1799 = vmax.xlane.f32.xlu1 %v1798_v14  ;;  %v1795_v15 = vsel %vm358_vm2, %v1716_v12, -inf }
 0x9d2   :  { %1796 = vmax.xlane.f32.xlu0 %v1795_v15 }
 0xa5e   :  { %v1800_v16 = vpop.xlane.xlu1 %1799 }
 0xa5f   :  { %v1802_v17 = vsub.f32 %v1792_v9, %v1800_v16  ;;  %v1797_v19 = vpop.xlane.xlu0 %1796 }
 0xa60   :  { %v1801_v20 = vsub.f32 %v1716_v12, %v1797_v19 }
 0xa61   :  { %v1805_v21 = vmul.f32 1.442695, %v1802_v17 }
 0xa62   :  { %v1803_v22 = vmul.f32 1.442695, %v1801_v20 }
 0xa63   :  { %6834 = vpow2.f32 %v1805_v21 }
 0xa64   :  { %6836 = vpow2.f32 %v1803_v22 }
 0xa6d   :  { %v6835_v23 = vpop.eup %6834 }
 0xa6e   :  { %v6837_v24 = vpop.eup %6836  ;;  %v1810_v25 = vsel %vm358_vm2, %v6835_v23, 0.0 }
 0xa6f   :  { %1811 = vadd.xlane.f32.xlu1 %v1810_v25  ;;  %v1807_v26 = vsel %vm358_vm2, %v6837_v24, 0.0  ;;  %v2607_v25 = vld [vmem:[%s7769_s5 + $0x18] sm:$0xff] }
 0xa70   :  { %1808 = vadd.xlane.f32.xlu0 %v1807_v26  ;;  %v49_v26 = vld [vmem:[%s7764_s0 + $0x8] sm:$0xff] }
 0xa71   :  { %v2750_v28 = vsel %vm58_vm0, %v49_v26, 0.0 }
 0xafc   :  { %v1812_v31 = vpop.xlane.xlu1 %1811 }
 0xafd   :  { %6838 = vrcp.f32 %v1812_v31  ;;  %v1809_v32 = vpop.xlane.xlu0 %1808 }
 0xafe   :  { %6840 = vrcp.f32 %v1809_v32 }
 0xb07   :  { %v6839_v35 = vpop.eup %6838 }
 0xb08   :  { %v6841_v36 = vpop.eup %6840  ;;  %v1816_v37 = vmul.f32 %v6839_v35, %v6835_v23 }
 0xb09   :  { %v1815_v39 = vmul.f32 %v6841_v36, %v6837_v24 }
 0xb0a   :  { %6254 = vmatmul.mubr.msk.f32.vlgmr.msra.gmra.mrb[24].mxu1 %vm358_vm2, %v1816_v37 }
 0xb0b   :  { %6656 = vmatpush3.bf16.msra.mxu1 %v6653_v29  ;;  %6249 = vmatmul.mubr.msk.f32.vlgmr.msra.gmra.mrb[16].mxu0 %vm358_vm2, %v1815_v39  ;;  %v2747_v29 = vsel %vm58_vm0, %v48_v27, 0.0 }
 0xb0c   :  { %6269 = vmatprep.mubr.msk.f32.mxu1 %vm58_vm0, %v7046_v2  ;;  %6658 = vmatprep.subr.bf16.mxu1 %v6657_v38 }
 0xb0d   :  { %6257 = vmatpush3.msra.mxu0 %v1963_v30 }
 0xb0e   :  { %6662 = vmatprep.subr.bf16.mxu0 %v6661_v48 }
 0xb0f   :  { %6660 = vmatpush3.bf16.msra.mxu1 %v6657_v38 }
 0xb10   :  { %6670 = vmatprep.subr.bf16.mxu1 %v6669_v42 }
 0xb12   :  { %6270 = vmatmul.mubr.msk.f32.vlgmr.msra.gmra.mrb[26].mxu1 %vm58_vm0, %v7058_v6 }
 0xb13   :  { %6672 = vmatpush3.bf16.msra.mxu1 %v6669_v42  ;;  %6291 = vmatprep.mubr.msk.f32.mxu1 %vm58_vm0, %v7046_v2 }
 0xb14   :  { %6674 = vmatprep.subr.bf16.mxu1 %v6673_v45 }
 0xb17   :  { %6676 = vmatpush3.bf16.msra.mxu1 %v6673_v45 }
 0xb18   :  { %6304 = vmatprep.subr.mxu1 %v6918_v8 }
 0xb1a   :  { %6292 = vmatmul.mubr.msk.f32.vlgmr.msra.gmra.mrb[28].mxu1 %vm58_vm0, %v7058_v6 }
 0xb1b   :  { %6306 = vmatprep.mubr.msk.f32.mxu1 %vm6919_vm1, %v6918_v8 }
 0xbdd   :  { %v1959_v51 = vpop.f32.mrb[24].mxu1 }
 0xbde   :  { %v1886_v52 = vpop.f32.mrb[16].mxu0  ;;  %v6255_v53 = vpop.f32.mrb[25].mxu1 }
 0xbdf   :  { %v6250_v55 = vpop.f32.mrb[17].mxu0  ;;  %6258 = vmatprep.mubr.msk.f32.mxu0 %vm358_vm2, %v1886_v52 }
 0xbe0   :  { %6259 = vmatmul.mubr.msk.f32.vlgmr.msra.gmra.mrb[10].mxu0 %vm358_vm2, %v1959_v51 }
 0xbe1   :  { %6664 = vmatpush3.bf16.msra.mxu0 %v6661_v48  ;;  %6280 = vmatprep.mubr.msk.f32.mxu0 %vm58_vm0, %v7046_v2 }
 0xbe2   :  { %6666 = vmatprep.subr.bf16.mxu0 %v6665_v54 }
 0xbe5   :  { %v6271_v56 = vpop.f32.mrb[26].mxu1  ;;  %6668 = vmatpush3.bf16.msra.mxu0 %v6665_v54 }
 0xbe6   :  { %v2118_v57 = vpop.f32.mrb[27].mxu1  ;;  %6294 = vmatprep.subr.mxu0 %v6918_v8 }
 0xbe8   :  { %6281 = vmatmul.mubr.msk.f32.vlgmr.msra.gmra.mrb[18].mxu0 %vm58_vm0, %v7058_v6 }
 0xbe9   :  { %6296 = vmatprep.mubr.msk.f32.mxu0 %vm6919_vm1, %v6918_v8 }
 0xbed   :  { %v6293_v58 = vpop.f32.mrb[28].mxu1 }
 0xbee   :  { %v2278_v59 = vpop.f32.mrb[29].mxu1 }
 0xbef   :  { %6305 = vmatpush3.msra.mxu1 %v2278_v59 }
 0xcbb   :  { %v6282_v60 = vpop.f32.mrb[18].mxu0 }
 0xcbc   :  { %v2198_v62 = vpop.f32.mrb[19].mxu0 }
 0xcbd   :  { %6295 = vmatpush3.xpose.msk.msra.mxu0 %vm358_vm2, %v2198_v62 }
 0xcbe   :  { %6299 = vmatprep.subr.mxu0 %v6918_v8 }
 0xcc0   :  { %6297 = vmatmul.mubr.msk.f32.vlgmr.msra.gmra.mrb[20].mxu0 %vm358_vm2, %v2118_v57 }
 0xcc1   :  { %6300 = vmatpush3.xpose.msk.msra.mxu0 %vm358_vm2, %v6282_v60  ;;  %6301 = vmatprep.mubr.msk.f32.mxu0 %vm6919_vm1, %v6918_v8 }
 0xcc2   :  { %6309 = vmatprep.subr.mxu0 %v6918_v8 }
 0xcc4   :  { %6302 = vmatmul.mubr.msk.f32.vlgmr.msra.gmra.mrb[22].mxu0 %vm358_vm2, %v6271_v56 }
 0xcc5   :  { %6310 = vmatpush3.msra.mxu0 %v6293_v58  ;;  %6311 = vmatprep.mubr.msk.f32.mxu0 %vm6919_vm1, %v6918_v8 }
 0xcc6   :  { %6314 = vmatprep.subr.mxu0 %v2607_v25 }
 0xd93   :  { %v2359_v2 = vpop.f32.mrb[20].mxu0 }
 0xd94   :  { %v2360_v6 = vadd.f32 %v2359_v2, %v7085_v18  ;;  %v6298_v3 = vpop.f32.mrb[21].mxu0 }
 0xd96   :  { %v2439_v61 = vsel %vm358_vm2, %v2360_v6, -inf }
 0xd97   :  { %2440 = vmax.xlane.f32.xlu0 %v2439_v61  ;;  %v2435_v4 = vpop.f32.mrb[22].mxu0  ;;  %v2888_v61 = vld [vmem:[%s7771_s7 + $0x10] sm:$0xff] }
 0xd98   :  { %v2436_v5 = vadd.f32 %v2435_v4, %v7085_v18  ;;  %v6303_v7 = vpop.f32.mrb[23].mxu0  ;;  %v2889_v4 = vld [vmem:[%s7771_s7 + $0x18] sm:$0xff] }
 0xd9a   :  { %v2442_v63 = vsel %vm358_vm2, %v2436_v5, -inf }
 0xd9b   :  { %2443 = vmax.xlane.f32.xlu1 %v2442_v63 }
 0xe24   :  { %v2441_v9 = vpop.xlane.xlu0 %2440 }
 0xe25   :  { %v2445_v10 = vsub.f32 %v2360_v6, %v2441_v9  ;;  %v2887_v6 = vld [vmem:[%s7771_s7 + $0x8] sm:$0xff] }
 0xe27   :  { %v2447_v11 = vmul.f32 1.442695, %v2445_v10 }
 0xe28   :  { %v2444_v12 = vpop.xlane.xlu1 %2443 }
 0xe29   :  { %6842 = vpow2.f32 %v2447_v11  ;;  %v2446_v13 = vsub.f32 %v2436_v5, %v2444_v12  ;;  %v6689_v5 = vpack.c.bf16 %v2889_v4, %v2888_v61 }
 0xe2b   :  { %v2449_v14 = vmul.f32 1.442695, %v2446_v13 }
 0xe2d   :  { %6844 = vpow2.f32 %v2449_v14 }
 0xe33   :  { %v6843_v15 = vpop.eup %6842 }
 0xe34   :  { %v2451_v16 = vsel %vm358_vm2, %v6843_v15, 0.0 }
 0xe35   :  { %2452 = vadd.xlane.f32.xlu0 %v2451_v16 }
 0xe37   :  { %v6845_v17 = vpop.eup %6844 }
 0xe38   :  { %v2454_v19 = vsel %vm358_vm2, %v6845_v17, 0.0 }
 0xe39   :  { %2455 = vadd.xlane.f32.xlu1 %v2454_v19  ;;  %2748 = vadd.xlane.f32.xlu0 %v2747_v29 }
 0xe3d   :  { %2751 = vadd.xlane.f32.xlu1 %v2750_v28 }
 0xec2   :  { %v2453_v18 = vpop.xlane.xlu0 %2452 }
 0xec3   :  { %6846 = vrcp.f32 %v2453_v18 }
 0xec6   :  { %v2456_v20 = vpop.xlane.xlu1 %2455  ;;  %v2749_v35 = vpop.xlane.xlu0 %2748 }
 0xec7   :  { %6848 = vrcp.f32 %v2456_v20  ;;  %v2753_v37 = vmul.f32 0.03125, %v2749_v35 }
 0xec9   :  { %v2755_v39 = vrot.slane %v2753_v37, 4 }
 0xeca   :  { %v2752_v34 = vpop.xlane.xlu1 %2751 }
 0xecb   :  { %v2754_v36 = vmul.f32 0.03125, %v2752_v34  ;;  %v2756_v41 = vadd.f32 %v2755_v39, %v2753_v37 }
 0xecd   :  { %v6847_v21 = vpop.eup %6846  ;;  %v2761_v38 = vrot.slane %v2754_v36, 4  ;;  %v2757_v43 = vrot.slane %v2756_v41, 2 }
 0xece   :  { %v2459_v22 = vmul.f32 %v6847_v21, %v6843_v15 }
 0xecf   :  { %v2762_v40 = vadd.f32 %v2761_v38, %v2754_v36  ;;  %v2758_v45 = vadd.f32 %v2757_v43, %v2756_v41 }
 0xed0   :  { %6307 = vmatmul.mubr.msk.f32.vlgmr.msra.gmra.mrb[30].mxu1 %vm358_vm2, %v2459_v22 }
 0xed1   :  { %v6849_v23 = vpop.eup %6848  ;;  %v2763_v42 = vrot.slane %v2762_v40, 2  ;;  %v2759_v47 = vrot.slane %v2758_v45, 1 }
 0xed2   :  { %v2460_v24 = vmul.f32 %v6849_v23, %v6845_v17 }
 0xed3   :  { %v2764_v44 = vadd.f32 %v2763_v42, %v2762_v40  ;;  %v2760_v49 = vadd.f32 %v2759_v47, %v2758_v45 }
 0xed4   :  { %6312 = vmatmul.mubr.msk.f32.vlgmr.msra.gmra.mrb[24].mxu0 %vm358_vm2, %v2460_v24 }
 0xed5   :  { %6315 = vmatpush3.msra.mxu0 %v2607_v25  ;;  %v2765_v46 = vrot.slane %v2764_v44, 1  ;;  %v2767_v51 = vmul.f32 0.125, %v2760_v49 }
 0xed7   :  { %v2766_v48 = vadd.f32 %v2765_v46, %v2764_v44  ;;  %v7347_v53 = vsub.f32 %v48_v27, %v2767_v51 }
 0xed9   :  { %v2768_v50 = vmul.f32 0.125, %v2766_v48  ;;  %v2771_v59 = vmul.f32 %v7347_v53, %v7347_v53 }
 0xedb   :  { %v7345_v52 = vsub.f32 %v49_v26, %v2768_v50  ;;  %v2773_v2 = vsel %vm58_vm0, %v2771_v59, 0.0  ;;  %v2801_v59 = vld [vmem:[%s7770_s6] sm:$0xff] }
 0xedd   :  { %v2772_v57 = vmul.f32 %v7345_v52, %v7345_v52 }
 0xfa3   :  { %v2530_v30 = vpop.f32.mrb[30].mxu1 }
 0xfa4   :  { %v6308_v31 = vpop.f32.mrb[31].mxu1  ;;  %6316 = vmatprep.mubr.msk.f32.mxu0 %vm358_vm2, %v2530_v30 }
 0xfa7   :  { %v2603_v32 = vpop.f32.mrb[24].mxu0 }
 0xfa8   :  { %v6313_v33 = vpop.f32.mrb[25].mxu0  ;;  %6317 = vmatmul.mubr.msk.f32.vlgmr.msra.gmra.mrb[10].mxu0 %vm358_vm2, %v2603_v32 }
0x107b   :  { %v6318_v54 = vpop.f32.mrb[10].mxu0 }
0x107c   :  { %v7350_v55 = vadd.f32 %v6318_v54, %v7006_v1  ;;  %v2680_v56 = vpop.f32.mrb[11].mxu0  ;;  %v2776_v1 = vsel %vm58_vm0, %v2772_v57, 0.0 }
0x107d   :  { %v7355_v58 = vadd.f32 %v2680_v56, %v7001_v0  ;;  %v2886_v0 = vld [vmem:[%s7771_s7] sm:$0xff] }
0x107e   :  { %v2696_v60 = vsel %vm58_vm0, %v7350_v55, 0.0  ;;  %v6685_v3 = vpack.c.bf16 %v2887_v6, %v2886_v0  ;;  %v2972_v0 = vld [vmem:[%s7772_s8 + $0x8] sm:$0xff] }
0x107f   :  { %2697 = vadd.xlane.f32.xlu1 %v2696_v60  ;;  %v2693_v62 = vsel %vm58_vm0, %v7355_v58, 0.0 }
0x1080   :  { %2694 = vadd.xlane.f32.xlu0 %v2693_v62  ;;  %6686 = vmatprep.subr.bf16.mxu0 %v6685_v3  ;;  %v2804_v62 = vld [vmem:[%s7770_s6 + $0x18] sm:$0xff] }
0x1081   :  { %6688 = vmatpush3.bf16.msra.mxu0 %v6685_v3 }
0x1082   :  { %6690 = vmatprep.subr.bf16.mxu0 %v6689_v5 }
0x1083   :  { %2777 = vadd.xlane.f32.xlu1 %v2776_v1 }
0x1084   :  { %2774 = vadd.xlane.f32.xlu0 %v2773_v2  ;;  %v2971_v2 = vld [vmem:[%s7772_s8] sm:$0xff] }
0x1085   :  { %6692 = vmatpush3.bf16.msra.mxu0 %v6689_v5  ;;  %v6693_v6 = vpack.c.bf16 %v2972_v0, %v2971_v2  ;;  %v5761_v0 = vld [vmem:[%s7771_s7 + $0x30] sm:$0xff] }
0x1086   :  { %6352 = vmatprep.subr.mxu0 %v6918_v8 }
0x110c   :  { %v2698_v7 = vpop.xlane.xlu1 %2697 }
0x110d   :  { %v2700_v63 = vmul.f32 0.03125, %v2698_v7  ;;  %v2695_v9 = vpop.xlane.xlu0 %2694 }
0x110e   :  { %v2699_v10 = vmul.f32 0.03125, %v2695_v9 }
0x110f   :  { %v2707_v11 = vrot.slane %v2700_v63, 4 }
0x1110   :  { %v2701_v12 = vrot.slane %v2699_v10, 4  ;;  %v2778_v13 = vpop.xlane.xlu1 %2777 }
0x1111   :  { %v2708_v14 = vadd.f32 %v2707_v11, %v2700_v63  ;;  %v2780_v15 = vmul.f32 0.03125, %v2778_v13  ;;  %v2775_v16 = vpop.xlane.xlu0 %2774 }
0x1112   :  { %v2702_v17 = vadd.f32 %v2701_v12, %v2699_v10  ;;  %v2779_v19 = vmul.f32 0.03125, %v2775_v16 }
0x1113   :  { %v2709_v18 = vrot.slane %v2708_v14, 2  ;;  %v2787_v20 = vrot.slane %v2780_v15, 4 }
0x1114   :  { %v2703_v21 = vrot.slane %v2702_v17, 2  ;;  %v2781_v22 = vrot.slane %v2779_v19, 4 }
0x1115   :  { %v2710_v23 = vadd.f32 %v2709_v18, %v2708_v14  ;;  %v2788_v24 = vadd.f32 %v2787_v20, %v2780_v15 }
0x1116   :  { %v2704_v25 = vadd.f32 %v2703_v21, %v2702_v17  ;;  %v2782_v26 = vadd.f32 %v2781_v22, %v2779_v19 }
0x1117   :  { %v2711_v27 = vrot.slane %v2710_v23, 1  ;;  %v2789_v28 = vrot.slane %v2788_v24, 2 }
0x1118   :  { %v2705_v29 = vrot.slane %v2704_v25, 1  ;;  %v2783_v30 = vrot.slane %v2782_v26, 2 }
0x1119   :  { %v2712_v31 = vadd.f32 %v2711_v27, %v2710_v23  ;;  %v2790_v32 = vadd.f32 %v2789_v28, %v2788_v24  ;;  %v2973_v24 = vld [vmem:[%s7772_s8 + $0x10] sm:$0xff] }
0x111a   :  { %v2706_v33 = vadd.f32 %v2705_v29, %v2704_v25  ;;  %v2784_v34 = vadd.f32 %v2783_v30, %v2782_v26  ;;  %v2974_v25 = vld [vmem:[%s7772_s8 + $0x18] sm:$0xff] }
0x111b   :  { %v2791_v35 = vrot.slane %v2790_v32, 1  ;;  %v2714_v36 = vmul.f32 0.125, %v2712_v31  ;;  %v6697_v29 = vpack.c.bf16 %v2974_v25, %v2973_v24 }
0x111c   :  { %v2785_v37 = vrot.slane %v2784_v34, 1  ;;  %v2713_v38 = vmul.f32 0.125, %v2706_v33 }
0x111d   :  { %v2792_v39 = vadd.f32 %v2791_v35, %v2790_v32  ;;  %v7379_v40 = vsub.f32 %v7350_v55, %v2714_v36 }
0x111e   :  { %v2786_v41 = vadd.f32 %v2785_v37, %v2784_v34  ;;  %v2715_v42 = vsub.f32 %v7355_v58, %v2713_v38 }
0x111f   :  { %v2794_v43 = vmul.f32 0.125, %v2792_v39  ;;  %v2718_v44 = vmul.f32 %v7379_v40, %v7379_v40 }
0x1120   :  { %v2793_v45 = vmul.f32 0.125, %v2786_v41  ;;  %v2717_v46 = vmul.f32 %v2715_v42, %v2715_v42 }
0x1121   :  { %v2796_v47 = vadd.f32 1e-05, %v2794_v43  ;;  %v2722_v48 = vsel %vm58_vm0, %v2718_v44, 0.0 }
0x1122   :  { %v2795_v49 = vadd.f32 1e-05, %v2793_v45  ;;  %2723 = vadd.xlane.f32.xlu1 %v2722_v48  ;;  %v2719_v50 = vsel %vm58_vm0, %v2717_v46, 0.0 }
0x1123   :  { %6850 = vrsqrt.f32 %v2796_v47  ;;  %2720 = vadd.xlane.f32.xlu0 %v2719_v50 }
0x1124   :  { %6852 = vrsqrt.f32 %v2795_v49 }
0x112d   :  { %v6851_v51 = vpop.eup %6850 }
0x112e   :  { %v6853_v54 = vpop.eup %6852  ;;  %v7390_v57 = vmul.f32 %v6851_v51, %v7345_v52  ;;  %v2803_v52 = vld [vmem:[%s7770_s6 + $0x10] sm:$0xff] }
0x112f   :  { %v7387_v56 = vmul.f32 %v6853_v54, %v7347_v53  ;;  %v2802_v53 = vld [vmem:[%s7770_s6 + $0x8] sm:$0xff]  ;;  %v6681_v1 = vpack.c.bf16 %v2804_v62, %v2803_v52  ;;  %v5759_v54 = vld [vmem:[%s7771_s7 + $0x20] sm:$0xff] }
0x1130   :  { %v6677_v60 = vpack.c.bf16 %v2802_v53, %v2801_v59  ;;  %v5760_v59 = vld [vmem:[%s7771_s7 + $0x28] sm:$0xff]  ;;  %v5753_v52 = vld [vmem:[%s7770_s6 + $0x20] sm:$0xff] }
0x1131   :  { %6338 = vmatprep.mubr.msk.f32.mxu0 %vm58_vm0, %v7387_v56  ;;  %v6709_v53 = vpack.c.bf16 %v5760_v59, %v5759_v54  ;;  %v5783_v54 = vld [vmem:[%s7770_s6 + $0x50] sm:$0xff]  ;;  %v5784_v59 = vld [vmem:[%s7770_s6 + $0x58] sm:$0xff] }
0x1132   :  { %6339 = vmatmul.mubr.msk.f32.vlgmr.msra.gmra.mrb[26].mxu0 %vm58_vm0, %v7390_v57  ;;  %6678 = vmatprep.subr.bf16.mxu1 %v6677_v60 }
0x1133   :  { %6354 = vmatprep.mubr.msk.f32.mxu0 %vm6919_vm1, %v6918_v8  ;;  %6680 = vmatpush3.bf16.msra.mxu1 %v6677_v60  ;;  %v5754_v60 = vld [vmem:[%s7770_s6 + $0x28] sm:$0xff] }
0x1134   :  { %6682 = vmatprep.subr.bf16.mxu1 %v6681_v1  ;;  %v6701_v62 = vpack.c.bf16 %v5754_v60, %v5753_v52  ;;  %v6729_v60 = vpack.c.bf16 %v5784_v59, %v5783_v54  ;;  %v5819_v59 = vld [vmem:[%s7772_s8 + $0x60] sm:$0xff] }
0x1137   :  { %6684 = vmatpush3.bf16.msra.mxu1 %v6681_v1 }
0x1138   :  { %6694 = vmatprep.subr.bf16.mxu1 %v6693_v6 }
0x11af   :  { %v2724_v3 = vpop.xlane.xlu1 %2723 }
0x11b0   :  { %v2726_v61 = vmul.f32 0.03125, %v2724_v3  ;;  %v2721_v4 = vpop.xlane.xlu0 %2720 }
0x11b1   :  { %v2725_v5 = vmul.f32 0.03125, %v2721_v4  ;;  %v5756_v4 = vld [vmem:[%s7770_s6 + $0x38] sm:$0xff] }
0x11b2   :  { %v2733_v7 = vrot.slane %v2726_v61, 4 }
0x11b3   :  { %v2727_v63 = vrot.slane %v2725_v5, 4 }
0x11b4   :  { %v2734_v9 = vadd.f32 %v2733_v7, %v2726_v61  ;;  %v5755_v61 = vld [vmem:[%s7770_s6 + $0x30] sm:$0xff] }
0x11b5   :  { %v2728_v10 = vadd.f32 %v2727_v63, %v2725_v5 }
0x11b6   :  { %v2735_v11 = vrot.slane %v2734_v9, 2 }
0x11b7   :  { %v2729_v12 = vrot.slane %v2728_v10, 2 }
0x11b8   :  { %v2736_v13 = vadd.f32 %v2735_v11, %v2734_v9  ;;  %v5765_v11 = vld [vmem:[%s7772_s8 + $0x20] sm:$0xff] }
0x11b9   :  { %v2730_v14 = vadd.f32 %v2729_v12, %v2728_v10  ;;  %v6705_v10 = vpack.c.bf16 %v5756_v4, %v5755_v61  ;;  %v5766_v12 = vld [vmem:[%s7772_s8 + $0x28] sm:$0xff]  ;;  %v3370_v4 = vld [vmem:[%s7773_s9] sm:$0xff] }
0x11ba   :  { %v2737_v15 = vrot.slane %v2736_v13, 1  ;;  %v3931_v61 = vld [vmem:[%s7773_s9 + $0x8] sm:$0xff] }
0x11bb   :  { %v2731_v16 = vrot.slane %v2730_v14, 1 }
0x11bc   :  { %v2738_v17 = vadd.f32 %v2737_v15, %v2736_v13  ;;  %v6717_v13 = vpack.c.bf16 %v5766_v12, %v5765_v11  ;;  %v5768_v15 = vld [vmem:[%s7772_s8 + $0x38] sm:$0xff] }
0x11bd   :  { %v2732_v19 = vadd.f32 %v2731_v16, %v2730_v14  ;;  %v5767_v14 = vld [vmem:[%s7772_s8 + $0x30] sm:$0xff] }
0x11be   :  { %v2740_v18 = vmul.f32 0.125, %v2738_v17  ;;  %v6721_v16 = vpack.c.bf16 %v5768_v15, %v5767_v14  ;;  %v5790_v14 = vld [vmem:[%s7771_s7 + $0x58] sm:$0xff] }
0x11bf   :  { %v2739_v20 = vmul.f32 0.125, %v2732_v19 }
0x11c0   :  { %v2742_v21 = vadd.f32 1e-05, %v2740_v18 }
0x11c1   :  { %v2741_v22 = vadd.f32 1e-05, %v2739_v20 }
0x11c2   :  { %6854 = vrsqrt.f32 %v2742_v21 }
0x11c3   :  { %6856 = vrsqrt.f32 %v2741_v22 }
0x11cc   :  { %v6855_v23 = vpop.eup %6854 }
0x11cd   :  { %v6857_v26 = vpop.eup %6856  ;;  %v7425_v28 = vmul.f32 %v6855_v23, %v7379_v40 }
0x11ce   :  { %v7422_v27 = vmul.f32 %v6857_v26, %v2715_v42 }
0x11d0   :  { %6327 = vmatprep.mubr.msk.f32.mxu1 %vm58_vm0, %v7422_v27 }
0x11d1   :  { %6328 = vmatmul.mubr.msk.f32.vlgmr.msra.gmra.mrb[32].mxu1 %vm58_vm0, %v7425_v28 }
0x11d2   :  { %6696 = vmatpush3.bf16.msra.mxu1 %v6693_v6  ;;  %6349 = vmatprep.mubr.msk.f32.mxu1 %vm58_vm0, %v7387_v56  ;;  %v5762_v6 = vld [vmem:[%s7771_s7 + $0x38] sm:$0xff] }
0x11d3   :  { %6698 = vmatprep.subr.bf16.mxu1 %v6697_v29  ;;  %v6713_v9 = vpack.c.bf16 %v5762_v6, %v5761_v0  ;;  %v5795_v0 = vld [vmem:[%s7772_s8 + $0x50] sm:$0xff]  ;;  %v5796_v6 = vld [vmem:[%s7772_s8 + $0x58] sm:$0xff] }
0x11d6   :  { %6700 = vmatpush3.bf16.msra.mxu1 %v6697_v29 }
0x11d7   :  { %6357 = vmatprep.subr.mxu1 %v6918_v8 }
0x11d9   :  { %6350 = vmatmul.mubr.msk.f32.vlgmr.msra.gmra.mrb[34].mxu1 %vm58_vm0, %v7390_v57 }
0x11da   :  { %6359 = vmatprep.mubr.msk.f32.mxu1 %vm6919_vm1, %v6918_v8 }
0x1205   :  { %v6340_v30 = vpop.f32.mrb[26].mxu0 }
0x1206   :  { %v2962_v31 = vpop.f32.mrb[27].mxu0  ;;  %6358 = vmatpush3.xpose.msk.msra.mxu1 %vm358_vm2, %v6340_v30 }
0x1207   :  { %6353 = vmatpush3.xpose.msk.msra.mxu0 %vm358_vm2, %v2962_v31  ;;  %6367 = vmatprep.subr.mxu1 %v6918_v8 }
0x1208   :  { %6362 = vmatprep.subr.mxu0 %v6918_v8 }
0x12a4   :  { %v6329_v32 = vpop.f32.mrb[32].mxu1 }
0x12a5   :  { %v2877_v33 = vpop.f32.mrb[33].mxu1  ;;  %6360 = vmatmul.mubr.msk.f32.vlgmr.msra.gmra.mrb[36].mxu1 %vm358_vm2, %v6329_v32 }
0x12a6   :  { %6355 = vmatmul.mubr.msk.f32.vlgmr.msra.gmra.mrb[28].mxu0 %vm358_vm2, %v2877_v33  ;;  %6369 = vmatprep.mubr.msk.f32.mxu1 %vm6919_vm1, %v6918_v8 }
0x12a7   :  { %6364 = vmatprep.mubr.msk.f32.mxu0 %vm6919_vm1, %v6918_v8 }
0x12ac   :  { %v6351_v34 = vpop.f32.mrb[34].mxu1 }
0x12ad   :  { %v3041_v35 = vpop.f32.mrb[35].mxu1  ;;  %6368 = vmatpush3.msra.mxu1 %v6351_v34 }
0x12ae   :  { %6363 = vmatpush3.msra.mxu0 %v3041_v35  ;;  %6710 = vmatprep.subr.bf16.mxu1 %v6709_v53 }
0x12af   :  { %6702 = vmatprep.subr.bf16.mxu0 %v6701_v62 }
0x1378   :  { %v3198_v36 = vpop.f32.mrb[36].mxu1 }
0x1379   :  { %v3122_v37 = vpop.f32.mrb[28].mxu0  ;;  %v6361_v38 = vpop.f32.mrb[37].mxu1  ;;  %v3205_v39 = vsel %vm358_vm2, %v3198_v36, -inf }
0x137a   :  { %v6356_v40 = vpop.f32.mrb[29].mxu0  ;;  %3206 = vmax.xlane.f32.xlu0 %v3205_v39  ;;  %v3202_v41 = vsel %vm358_vm2, %v3122_v37, -inf }
0x137b   :  { %3203 = vmax.xlane.f32.xlu1 %v3202_v41 }
0x1407   :  { %v3207_v42 = vpop.xlane.xlu0 %3206 }
0x1408   :  { %v3209_v43 = vsub.f32 %v3198_v36, %v3207_v42  ;;  %v3204_v44 = vpop.xlane.xlu1 %3203 }
0x1409   :  { %v3208_v45 = vsub.f32 %v3122_v37, %v3204_v44 }
0x140a   :  { %v3212_v46 = vmul.f32 1.442695, %v3209_v43 }
0x140b   :  { %v3210_v47 = vmul.f32 1.442695, %v3208_v45  ;;  %v5781_v45 = vld [vmem:[%s7770_s6 + $0x40] sm:$0xff] }
0x140c   :  { %6858 = vpow2.f32 %v3212_v46  ;;  %v5782_v46 = vld [vmem:[%s7770_s6 + $0x48] sm:$0xff] }
0x140d   :  { %6860 = vpow2.f32 %v3210_v47  ;;  %v6725_v47 = vpack.c.bf16 %v5782_v46, %v5781_v45  ;;  %v5809_v46 = vld [vmem:[%s7770_s6 + $0x70] sm:$0xff] }
0x1416   :  { %v6859_v48 = vpop.eup %6858 }
0x1417   :  { %v6861_v49 = vpop.eup %6860  ;;  %v3217_v50 = vsel %vm358_vm2, %v6859_v48, 0.0 }
0x1418   :  { %3218 = vadd.xlane.f32.xlu0 %v3217_v50  ;;  %v3214_v51 = vsel %vm358_vm2, %v6861_v49, 0.0 }
0x1419   :  { %3215 = vadd.xlane.f32.xlu1 %v3214_v51 }
0x14a5   :  { %v3219_v1 = vpop.xlane.xlu0 %3218 }
0x14a6   :  { %6862 = vrcp.f32 %v3219_v1  ;;  %v3216_v2 = vpop.xlane.xlu1 %3215  ;;  %v5794_v1 = vld [vmem:[%s7772_s8 + $0x48] sm:$0xff] }
0x14a7   :  { %6864 = vrcp.f32 %v3216_v2 }
0x14b0   :  { %v6863_v3 = vpop.eup %6862 }
0x14b1   :  { %v6865_v5 = vpop.eup %6864  ;;  %v3223_v7 = vmul.f32 %v6863_v3, %v6859_v48  ;;  %v6745_v3 = vpack.c.bf16 %v5796_v6, %v5795_v0  ;;  %v5815_v0 = vld [vmem:[%s7771_s7 + $0x70] sm:$0xff]  ;;  %v5816_v6 = vld [vmem:[%s7771_s7 + $0x78] sm:$0xff] }
0x14b2   :  { %v3222_v63 = vmul.f32 %v6865_v5, %v6861_v49 }
0x14b3   :  { %6370 = vmatmul.mubr.msk.f32.vlgmr.msra.gmra.mrb[38].mxu1 %vm358_vm2, %v3223_v7  ;;  %v5787_v7 = vld [vmem:[%s7771_s7 + $0x40] sm:$0xff] }
0x14b4   :  { %6712 = vmatpush3.bf16.msra.mxu1 %v6709_v53  ;;  %6365 = vmatmul.mubr.msk.f32.vlgmr.msra.gmra.mrb[30].mxu0 %vm358_vm2, %v3222_v63  ;;  %v5788_v63 = vld [vmem:[%s7771_s7 + $0x48] sm:$0xff] }
0x14b5   :  { %6704 = vmatpush3.bf16.msra.mxu0 %v6701_v62  ;;  %6391 = vmatprep.mubr.msk.f32.mxu1 %vm58_vm0, %v7387_v56  ;;  %v5793_v62 = vld [vmem:[%s7772_s8 + $0x40] sm:$0xff] }
0x14b6   :  { %6380 = vmatprep.mubr.msk.f32.mxu0 %vm58_vm0, %v7422_v27  ;;  %6714 = vmatprep.subr.bf16.mxu1 %v6713_v9  ;;  %v6741_v2 = vpack.c.bf16 %v5794_v1, %v5793_v62  ;;  %v5822_v62 = vld [vmem:[%s7772_s8 + $0x78] sm:$0xff] }
0x14b7   :  { %6706 = vmatprep.subr.bf16.mxu0 %v6705_v10 }
0x14b8   :  { %6716 = vmatpush3.bf16.msra.mxu1 %v6713_v9 }
0x14b9   :  { %6708 = vmatpush3.bf16.msra.mxu0 %v6705_v10  ;;  %6405 = vmatprep.subr.mxu1 %v6918_v8  ;;  %v6733_v10 = vpack.c.bf16 %v5788_v63, %v5787_v7 }
0x14ba   :  { %6718 = vmatprep.subr.bf16.mxu0 %v6717_v13 }
0x14bb   :  { %6392 = vmatmul.mubr.msk.f32.vlgmr.msra.gmra.mrb[40].mxu1 %vm58_vm0, %v7390_v57 }
0x14bc   :  { %6381 = vmatmul.mubr.msk.f32.vlgmr.msra.gmra.mrb[32].mxu0 %vm58_vm0, %v7425_v28  ;;  %6407 = vmatprep.mubr.msk.f32.mxu1 %vm6919_vm1, %v6918_v8 }
0x14bd   :  { %6720 = vmatpush3.bf16.msra.mxu0 %v6717_v13  ;;  %6402 = vmatprep.mubr.msk.f32.mxu0 %vm58_vm0, %v7387_v56  ;;  %v5789_v13 = vld [vmem:[%s7771_s7 + $0x50] sm:$0xff] }
0x14be   :  { %6722 = vmatprep.subr.bf16.mxu0 %v6721_v16  ;;  %v6737_v15 = vpack.c.bf16 %v5790_v14, %v5789_v13 }
0x14c1   :  { %6724 = vmatpush3.bf16.msra.mxu0 %v6721_v16 }
0x14c2   :  { %6415 = vmatprep.subr.mxu0 %v6918_v8 }
0x14c4   :  { %6403 = vmatmul.mubr.msk.f32.vlgmr.msra.gmra.mrb[34].mxu0 %vm58_vm0, %v7390_v57 }
0x14c5   :  { %6417 = vmatprep.mubr.msk.f32.mxu0 %vm6919_vm1, %v6918_v8 }
0x1586   :  { %v7508_v17 = vpop.f32.mrb[38].mxu1 }
0x1587   :  { %v7510_v19 = vpop.f32.mrb[30].mxu0  ;;  %v6371_v18 = vpop.f32.mrb[39].mxu1 }
0x1588   :  { %v6366_v20 = vpop.f32.mrb[31].mxu0 }
0x158e   :  { %v6393_v21 = vpop.f32.mrb[40].mxu1 }
0x158f   :  { %v6382_v22 = vpop.f32.mrb[32].mxu0  ;;  %v3522_v23 = vpop.f32.mrb[41].mxu1 }
0x1590   :  { %v3442_v24 = vpop.f32.mrb[33].mxu0  ;;  %6406 = vmatpush3.xpose.msk.msra.mxu1 %vm358_vm2, %v3522_v23 }
0x1591   :  { %6410 = vmatprep.subr.mxu1 %v6918_v8 }
0x1593   :  { %6408 = vmatmul.mubr.msk.f32.vlgmr.msra.gmra.mrb[42].mxu1 %vm358_vm2, %v3442_v24 }
0x1594   :  { %6411 = vmatpush3.xpose.msk.msra.mxu1 %vm358_vm2, %v6393_v21  ;;  %6412 = vmatprep.mubr.msk.f32.mxu1 %vm6919_vm1, %v6918_v8 }
0x1595   :  { %6420 = vmatprep.subr.mxu1 %v6918_v8 }
0x1597   :  { %v6404_v25 = vpop.f32.mrb[34].mxu0  ;;  %6413 = vmatmul.mubr.msk.f32.vlgmr.msra.gmra.mrb[44].mxu1 %vm358_vm2, %v6382_v22 }
0x1598   :  { %v3602_v26 = vpop.f32.mrb[35].mxu0  ;;  %6421 = vmatpush3.msra.mxu1 %v6404_v25  ;;  %6422 = vmatprep.mubr.msk.f32.mxu1 %vm6919_vm1, %v6918_v8 }
0x1599   :  { %6416 = vmatpush3.msra.mxu0 %v3602_v26  ;;  %6726 = vmatprep.subr.bf16.mxu1 %v6725_v47 }
0x159a   :  { %6425 = vmatprep.subr.mxu0 %v3931_v61 }
0x1666   :  { %v3683_v29 = vpop.f32.mrb[42].mxu1 }
0x1667   :  { %v6409_v30 = vpop.f32.mrb[43].mxu1  ;;  %v3763_v31 = vsel %vm358_vm2, %v3683_v29, -inf }
0x1668   :  { %3764 = vmax.xlane.f32.xlu0 %v3763_v31 }
0x166a   :  { %v3759_v32 = vpop.f32.mrb[44].mxu1 }
0x166b   :  { %v6414_v33 = vpop.f32.mrb[45].mxu1  ;;  %v3766_v34 = vsel %vm358_vm2, %v3759_v32, -inf }
0x166c   :  { %3767 = vmax.xlane.f32.xlu1 %v3766_v34 }
0x16f5   :  { %v3765_v35 = vpop.xlane.xlu0 %3764 }
0x16f6   :  { %v3769_v36 = vsub.f32 %v3683_v29, %v3765_v35 }
0x16f8   :  { %v3771_v37 = vmul.f32 1.442695, %v3769_v36 }
0x16f9   :  { %v3768_v38 = vpop.xlane.xlu1 %3767 }
0x16fa   :  { %6866 = vpow2.f32 %v3771_v37  ;;  %v3770_v39 = vsub.f32 %v3759_v32, %v3768_v38 }
0x16fc   :  { %v3773_v40 = vmul.f32 1.442695, %v3770_v39 }
0x16fe   :  { %6868 = vpow2.f32 %v3773_v40  ;;  %v5807_v40 = vld [vmem:[%s7770_s6 + $0x60] sm:$0xff] }
0x1704   :  { %v6867_v41 = vpop.eup %6866 }
0x1705   :  { %v3775_v42 = vsel %vm358_vm2, %v6867_v41, 0.0 }
0x1706   :  { %3776 = vadd.xlane.f32.xlu0 %v3775_v42 }
0x1708   :  { %v6869_v43 = vpop.eup %6868 }
0x1709   :  { %v3778_v44 = vsel %vm358_vm2, %v6869_v43, 0.0 }
0x170a   :  { %3779 = vadd.xlane.f32.xlu1 %v3778_v44 }
0x1793   :  { %v3777_v48 = vpop.xlane.xlu0 %3776 }
0x1794   :  { %6870 = vrcp.f32 %v3777_v48 }
0x1797   :  { %v3780_v49 = vpop.xlane.xlu1 %3779 }
0x1798   :  { %6872 = vrcp.f32 %v3780_v49 }
0x179e   :  { %v6871_v50 = vpop.eup %6870 }
0x179f   :  { %v3783_v51 = vmul.f32 %v6871_v50, %v6867_v41  ;;  %v5808_v41 = vld [vmem:[%s7770_s6 + $0x68] sm:$0xff] }
0x17a0   :  { %v6749_v42 = vpack.c.bf16 %v5808_v41, %v5807_v40 }
0x17a1   :  { %6418 = vmatmul.mubr.msk.f32.vlgmr.msra.gmra.mrb[36].mxu0 %vm358_vm2, %v3783_v51 }
0x17a2   :  { %v6873_v53 = vpop.eup %6872  ;;  %6426 = vmatpush3.msra.mxu0 %v3931_v61 }
0x17a3   :  { %v3784_v52 = vmul.f32 %v6873_v53, %v6869_v43  ;;  %6430 = vmatprep.subr.mxu0 %v3370_v4  ;;  %v4654_v43 = vld [vmem:[%s7773_s9 + $0x10] sm:$0xff]  ;;  %v5820_v53 = vld [vmem:[%s7772_s8 + $0x68] sm:$0xff] }
0x17a5   :  { %6423 = vmatmul.mubr.msk.f32.vlgmr.msra.gmra.mrb[46].mxu1 %vm358_vm2, %v3784_v52  ;;  %v6765_v52 = vpack.c.bf16 %v5820_v53, %v5819_v59 }
0x17a6   :  { %6728 = vmatpush3.bf16.msra.mxu1 %v6725_v47  ;;  %6443 = vmatprep.mubr.msk.f32.mxu1 %vm58_vm0, %v7422_v27  ;;  %v5810_v47 = vld [vmem:[%s7770_s6 + $0x78] sm:$0xff] }
0x17a7   :  { %6730 = vmatprep.subr.bf16.mxu1 %v6729_v60  ;;  %v6753_v51 = vpack.c.bf16 %v5810_v47, %v5809_v46 }
0x17aa   :  { %6732 = vmatpush3.bf16.msra.mxu1 %v6729_v60  ;;  %v5821_v60 = vld [vmem:[%s7772_s8 + $0x70] sm:$0xff] }
0x17ab   :  { %6742 = vmatprep.subr.bf16.mxu1 %v6741_v2  ;;  %v6769_v1 = vpack.c.bf16 %v5822_v62, %v5821_v60 }
0x17ad   :  { %6444 = vmatmul.mubr.msk.f32.vlgmr.msra.gmra.mrb[48].mxu1 %vm58_vm0, %v7425_v28 }
0x17ae   :  { %6744 = vmatpush3.bf16.msra.mxu1 %v6741_v2  ;;  %6465 = vmatprep.mubr.msk.f32.mxu1 %vm58_vm0, %v7387_v56 }
0x17af   :  { %6746 = vmatprep.subr.bf16.mxu1 %v6745_v3 }
0x17b2   :  { %6748 = vmatpush3.bf16.msra.mxu1 %v6745_v3 }
0x17b3   :  { %6473 = vmatprep.subr.mxu1 %v6918_v8 }
0x17b5   :  { %6466 = vmatmul.mubr.msk.f32.vlgmr.msra.gmra.mrb[50].mxu1 %vm58_vm0, %v7390_v57 }
0x17b6   :  { %6475 = vmatprep.mubr.msk.f32.mxu1 %vm6919_vm1, %v6918_v8 }
0x1874   :  { %v3854_v5 = vpop.f32.mrb[36].mxu0 }
0x1875   :  { %v6419_v9 = vpop.f32.mrb[37].mxu0  ;;  %6427 = vmatprep.mubr.msk.f32.mxu0 %vm358_vm2, %v3854_v5  ;;  %v6761_v5 = vpack.c.bf16 %v5816_v6, %v5815_v0 }
0x1878   :  { %v3927_v11 = vpop.f32.mrb[46].mxu1 }
0x1879   :  { %v6424_v12 = vpop.f32.mrb[47].mxu1  ;;  %6428 = vmatmul.mubr.msk.f32.vlgmr.msra.gmra.mrb[38].mxu0 %vm358_vm2, %v3927_v11 }
0x187a   :  { %6431 = vmatpush3.msra.mxu0 %v3370_v4  ;;  %6432 = vmatprep.mubr.msk.f32.mxu0 %vm358_vm2, %v7510_v19 }
0x187b   :  { %6734 = vmatprep.subr.bf16.mxu0 %v6733_v10 }
0x1880   :  { %v6445_v16 = vpop.f32.mrb[48].mxu1 }
0x1881   :  { %v4165_v18 = vpop.f32.mrb[49].mxu1  ;;  %6433 = vmatmul.mubr.msk.f32.vlgmr.msra.gmra.mrb[38].mxu0 %vm358_vm2, %v7508_v17 }
0x1882   :  { %6736 = vmatpush3.bf16.msra.mxu0 %v6733_v10  ;;  %6454 = vmatprep.mubr.msk.f32.mxu0 %vm58_vm0, %v7387_v56 }
0x1883   :  { %6738 = vmatprep.subr.bf16.mxu0 %v6737_v15 }
0x1886   :  { %6740 = vmatpush3.bf16.msra.mxu0 %v6737_v15 }
0x1887   :  { %6468 = vmatprep.subr.mxu0 %v6918_v8 }
0x1888   :  { %v6467_v19 = vpop.f32.mrb[50].mxu1 }
0x1889   :  { %6455 = vmatmul.mubr.msk.f32.vlgmr.msra.gmra.mrb[40].mxu0 %vm58_vm0, %v7390_v57  ;;  %v4325_v20 = vpop.f32.mrb[51].mxu1 }
0x188a   :  { %6470 = vmatprep.mubr.msk.f32.mxu0 %vm6919_vm1, %v6918_v8 }
0x195c   :  { %v6456_v21 = vpop.f32.mrb[40].mxu0 }
0x195d   :  { %v4245_v22 = vpop.f32.mrb[41].mxu0  ;;  %6474 = vmatpush3.xpose.msk.msra.mxu1 %vm358_vm2, %v6456_v21 }
0x195e   :  { %6469 = vmatpush3.xpose.msk.msra.mxu0 %vm358_vm2, %v4245_v22  ;;  %6483 = vmatprep.subr.mxu1 %v6918_v8 }
0x195f   :  { %6478 = vmatprep.subr.mxu0 %v6918_v8 }
0x1960   :  { %6476 = vmatmul.mubr.msk.f32.vlgmr.msra.gmra.mrb[52].mxu1 %vm358_vm2, %v6445_v16 }
0x1961   :  { %6471 = vmatmul.mubr.msk.f32.vlgmr.msra.gmra.mrb[42].mxu0 %vm358_vm2, %v4165_v18  ;;  %6484 = vmatpush3.msra.mxu1 %v6467_v19 }
0x1962   :  { %6479 = vmatpush3.msra.mxu0 %v4325_v20  ;;  %6485 = vmatprep.mubr.msk.f32.mxu1 %vm6919_vm1, %v6918_v8 }
0x1963   :  { %6480 = vmatprep.mubr.msk.f32.mxu0 %vm6919_vm1, %v6918_v8  ;;  %6750 = vmatprep.subr.bf16.mxu1 %v6749_v42 }
0x1964   :  { %6488 = vmatprep.subr.mxu0 %v4654_v43 }
0x1a33   :  { %v4482_v17 = vpop.f32.mrb[52].mxu1 }
0x1a34   :  { %v4406_v23 = vpop.f32.mrb[42].mxu0  ;;  %v6477_v24 = vpop.f32.mrb[53].mxu1  ;;  %v4489_v25 = vsel %vm358_vm2, %v4482_v17, -inf }
0x1a35   :  { %v6472_v26 = vpop.f32.mrb[43].mxu0  ;;  %4490 = vmax.xlane.f32.xlu1 %v4489_v25  ;;  %v4486_v29 = vsel %vm358_vm2, %v4406_v23, -inf }
0x1a36   :  { %4487 = vmax.xlane.f32.xlu0 %v4486_v29 }
0x1ac2   :  { %v4491_v30 = vpop.xlane.xlu1 %4490 }
0x1ac3   :  { %v4493_v31 = vsub.f32 %v4482_v17, %v4491_v30  ;;  %v4488_v32 = vpop.xlane.xlu0 %4487 }
0x1ac4   :  { %v4492_v33 = vsub.f32 %v4406_v23, %v4488_v32 }
0x1ac5   :  { %v4496_v34 = vmul.f32 1.442695, %v4493_v31 }
0x1ac6   :  { %v4494_v35 = vmul.f32 1.442695, %v4492_v33 }
0x1ac7   :  { %6874 = vpow2.f32 %v4496_v34 }
0x1ac8   :  { %6876 = vpow2.f32 %v4494_v35  ;;  %v5298_v35 = vld [vmem:[%s7773_s9 + $0x18] sm:$0xff] }
0x1ad1   :  { %v6875_v36 = vpop.eup %6874 }
0x1ad2   :  { %v6877_v37 = vpop.eup %6876  ;;  %v4501_v38 = vsel %vm358_vm2, %v6875_v36, 0.0 }
0x1ad3   :  { %4502 = vadd.xlane.f32.xlu1 %v4501_v38  ;;  %v4498_v39 = vsel %vm358_vm2, %v6877_v37, 0.0 }
0x1ad4   :  { %4499 = vadd.xlane.f32.xlu0 %v4498_v39 }
0x1b60   :  { %v4503_v44 = vpop.xlane.xlu1 %4502 }
0x1b61   :  { %6878 = vrcp.f32 %v4503_v44  ;;  %v4500_v45 = vpop.xlane.xlu0 %4499 }
0x1b62   :  { %6880 = vrcp.f32 %v4500_v45 }
0x1b6b   :  { %v6879_v48 = vpop.eup %6878 }
0x1b6c   :  { %v6881_v49 = vpop.eup %6880  ;;  %v4507_v50 = vmul.f32 %v6879_v48, %v6875_v36 }
0x1b6d   :  { %v4506_v54 = vmul.f32 %v6881_v49, %v6877_v37 }
0x1b6e   :  { %6486 = vmatmul.mubr.msk.f32.vlgmr.msra.gmra.mrb[54].mxu1 %vm358_vm2, %v4507_v50 }
0x1b6f   :  { %6752 = vmatpush3.bf16.msra.mxu1 %v6749_v42  ;;  %6481 = vmatmul.mubr.msk.f32.vlgmr.msra.gmra.mrb[44].mxu0 %vm358_vm2, %v4506_v54 }
0x1b70   :  { %6501 = vmatprep.mubr.msk.f32.mxu1 %vm58_vm0, %v7422_v27  ;;  %6754 = vmatprep.subr.bf16.mxu1 %v6753_v51  ;;  %v5813_v27 = vld [vmem:[%s7771_s7 + $0x60] sm:$0xff] }
0x1b71   :  { %6489 = vmatpush3.msra.mxu0 %v4654_v43 }
0x1b73   :  { %6756 = vmatpush3.bf16.msra.mxu1 %v6753_v51 }
0x1b74   :  { %6766 = vmatprep.subr.bf16.mxu1 %v6765_v52 }
0x1b76   :  { %6502 = vmatmul.mubr.msk.f32.vlgmr.msra.gmra.mrb[56].mxu1 %vm58_vm0, %v7425_v28  ;;  %v5814_v28 = vld [vmem:[%s7771_s7 + $0x68] sm:$0xff] }
0x1b77   :  { %6768 = vmatpush3.bf16.msra.mxu1 %v6765_v52  ;;  %6523 = vmatprep.mubr.msk.f32.mxu1 %vm58_vm0, %v7387_v56  ;;  %v6757_v2 = vpack.c.bf16 %v5814_v28, %v5813_v27 }
0x1b78   :  { %6770 = vmatprep.subr.bf16.mxu1 %v6769_v1 }
0x1b79   :  { %6758 = vmatprep.subr.bf16.mxu0 %v6757_v2 }
0x1b7b   :  { %6772 = vmatpush3.bf16.msra.mxu1 %v6769_v1 }
0x1b7c   :  { %6536 = vmatprep.subr.mxu1 %v6918_v8 }
0x1b7e   :  { %6524 = vmatmul.mubr.msk.f32.vlgmr.msra.gmra.mrb[58].mxu1 %vm58_vm0, %v7390_v57 }
0x1b7f   :  { %6538 = vmatprep.mubr.msk.f32.mxu1 %vm6919_vm1, %v6918_v8 }
0x1c41   :  { %v4650_v3 = vpop.f32.mrb[54].mxu1 }
0x1c42   :  { %v4577_v61 = vpop.f32.mrb[44].mxu0  ;;  %v6487_v4 = vpop.f32.mrb[55].mxu1 }
0x1c43   :  { %v6482_v7 = vpop.f32.mrb[45].mxu0  ;;  %6490 = vmatprep.mubr.msk.f32.mxu0 %vm358_vm2, %v4577_v61 }
0x1c44   :  { %6491 = vmatmul.mubr.msk.f32.vlgmr.msra.gmra.mrb[38].mxu0 %vm358_vm2, %v4650_v3  ;;  %v5438_v7 = vld [vmem:[%s7774_s10] sm:$0xff] }
0x1c45   :  { %6760 = vmatpush3.bf16.msra.mxu0 %v6757_v2  ;;  %6512 = vmatprep.mubr.msk.f32.mxu0 %vm58_vm0, %v7387_v56 }
0x1c46   :  { %6762 = vmatprep.subr.bf16.mxu0 %v6761_v5 }
0x1c49   :  { %v6503_v63 = vpop.f32.mrb[56].mxu1  ;;  %6764 = vmatpush3.bf16.msra.mxu0 %v6761_v5 }
0x1c4a   :  { %v4809_v9 = vpop.f32.mrb[57].mxu1  ;;  %6526 = vmatprep.subr.mxu0 %v6918_v8 }
0x1c4c   :  { %6513 = vmatmul.mubr.msk.f32.vlgmr.msra.gmra.mrb[46].mxu0 %vm58_vm0, %v7390_v57 }
0x1c4d   :  { %6528 = vmatprep.mubr.msk.f32.mxu0 %vm6919_vm1, %v6918_v8 }
0x1c51   :  { %v6525_v10 = vpop.f32.mrb[58].mxu1 }
0x1c52   :  { %v4969_v11 = vpop.f32.mrb[59].mxu1 }
0x1c53   :  { %6537 = vmatpush3.msra.mxu1 %v4969_v11  ;;  %v5441_v11 = vld [vmem:[%s7774_s10 + $0x18] sm:$0xff] }
0x1d1f   :  { %v6514_v12 = vpop.f32.mrb[46].mxu0 }
0x1d20   :  { %v4889_v13 = vpop.f32.mrb[47].mxu0 }
0x1d21   :  { %6527 = vmatpush3.xpose.msk.msra.mxu0 %vm358_vm2, %v4889_v13  ;;  %v5532_v13 = vld [vmem:[%s7776_s12] sm:$0xff] }
0x1d22   :  { %6531 = vmatprep.subr.mxu0 %v6918_v8 }
0x1d24   :  { %6529 = vmatmul.mubr.msk.f32.vlgmr.msra.gmra.mrb[48].mxu0 %vm358_vm2, %v4809_v9  ;;  %v5440_v9 = vld [vmem:[%s7774_s10 + $0x10] sm:$0xff] }
0x1d25   :  { %6532 = vmatpush3.xpose.msk.msra.mxu0 %vm358_vm2, %v6514_v12  ;;  %6533 = vmatprep.mubr.msk.f32.mxu0 %vm6919_vm1, %v6918_v8  ;;  %v6777_v12 = vpack.c.bf16 %v5441_v11, %v5440_v9 }
0x1d26   :  { %6541 = vmatprep.subr.mxu0 %v6918_v8 }
0x1d28   :  { %6534 = vmatmul.mubr.msk.f32.vlgmr.msra.gmra.mrb[50].mxu0 %vm358_vm2, %v6503_v63  ;;  %v5439_v63 = vld [vmem:[%s7774_s10 + $0x8] sm:$0xff] }
0x1d29   :  { %6542 = vmatpush3.msra.mxu0 %v6525_v10  ;;  %6543 = vmatprep.mubr.msk.f32.mxu0 %vm6919_vm1, %v6918_v8  ;;  %v6773_v10 = vpack.c.bf16 %v5439_v63, %v5438_v7 }
0x1d2a   :  { %6546 = vmatprep.subr.mxu0 %v5298_v35 }
0x1d2b   :  { %6774 = vmatprep.subr.bf16.mxu1 %v6773_v10 }
0x1df7   :  { %v5050_v56 = vpop.f32.mrb[48].mxu0 }
0x1df8   :  { %v6530_v57 = vpop.f32.mrb[49].mxu0  ;;  %v5130_v14 = vsel %vm358_vm2, %v5050_v56, -inf }
0x1df9   :  { %5131 = vmax.xlane.f32.xlu0 %v5130_v14  ;;  %v5534_v57 = vld [vmem:[%s7776_s12 + $0x10] sm:$0xff] }
0x1dfb   :  { %v5126_v15 = vpop.f32.mrb[50].mxu0 }
0x1dfc   :  { %v6535_v16 = vpop.f32.mrb[51].mxu0  ;;  %v5133_v18 = vsel %vm358_vm2, %v5126_v15, -inf }
0x1dfd   :  { %5134 = vmax.xlane.f32.xlu1 %v5133_v18  ;;  %v5536_v18 = vld [vmem:[%s7776_s12 + $0x20] sm:$0xff] }
0x1e86   :  { %v5132_v19 = vpop.xlane.xlu0 %5131 }
0x1e87   :  { %v5136_v20 = vsub.f32 %v5050_v56, %v5132_v19  ;;  %v5533_v56 = vld [vmem:[%s7776_s12 + $0x8] sm:$0xff] }
0x1e88   :  { %v6781_v14 = vpack.c.bf16 %v5533_v56, %v5532_v13  ;;  %v5537_v19 = vld [vmem:[%s7776_s12 + $0x28] sm:$0xff] }
0x1e89   :  { %v5138_v21 = vmul.f32 1.442695, %v5136_v20  ;;  %v6789_v20 = vpack.c.bf16 %v5537_v19, %v5536_v18 }
0x1e8a   :  { %v5135_v22 = vpop.xlane.xlu1 %5134 }
0x1e8b   :  { %6882 = vpow2.f32 %v5138_v21  ;;  %v5137_v17 = vsub.f32 %v5126_v15, %v5135_v22  ;;  %v5535_v15 = vld [vmem:[%s7776_s12 + $0x18] sm:$0xff] }
0x1e8c   :  { %v6785_v16 = vpack.c.bf16 %v5535_v15, %v5534_v57 }
0x1e8d   :  { %v5140_v23 = vmul.f32 1.442695, %v5137_v17 }
0x1e8f   :  { %6884 = vpow2.f32 %v5140_v23 }
0x1e95   :  { %v6883_v24 = vpop.eup %6882 }
0x1e96   :  { %v5142_v8 = vsel %vm358_vm2, %v6883_v24, 0.0 }
0x1e97   :  { %5143 = vadd.xlane.f32.xlu0 %v5142_v8 }
0x1e99   :  { %v6885_v25 = vpop.eup %6884 }
0x1e9a   :  { %v5145_v26 = vsel %vm358_vm2, %v6885_v25, 0.0 }
0x1e9b   :  { %5146 = vadd.xlane.f32.xlu1 %v5145_v26 }
0x1f24   :  { %v5144_v29 = vpop.xlane.xlu0 %5143 }
0x1f25   :  { %6886 = vrcp.f32 %v5144_v29 }
0x1f28   :  { %v5147_v30 = vpop.xlane.xlu1 %5146 }
0x1f29   :  { %6888 = vrcp.f32 %v5147_v30 }
0x1f2f   :  { %v6887_v31 = vpop.eup %6886 }
0x1f30   :  { %v5150_v32 = vmul.f32 %v6887_v31, %v6883_v24 }
0x1f32   :  { %6539 = vmatmul.mubr.msk.f32.vlgmr.msra.gmra.mrb[60].mxu1 %vm358_vm2, %v5150_v32 }
0x1f33   :  { %v6889_v33 = vpop.eup %6888  ;;  %6776 = vmatpush3.bf16.msra.mxu1 %v6773_v10 }
0x1f34   :  { %v5151_v34 = vmul.f32 %v6889_v33, %v6885_v25  ;;  %6778 = vmatprep.subr.bf16.mxu1 %v6777_v12 }
0x1f36   :  { %6544 = vmatmul.mubr.msk.f32.vlgmr.msra.gmra.mrb[52].mxu0 %vm358_vm2, %v5151_v34 }
0x1f37   :  { %6547 = vmatpush3.msra.mxu0 %v5298_v35  ;;  %6780 = vmatpush3.bf16.msra.mxu1 %v6777_v12 }
0x1f38   :  { %6782 = vmatprep.subr.bf16.mxu0 %v6781_v14 }
0x2005   :  { %v5221_v36 = vpop.f32.mrb[60].mxu1 }
0x2006   :  { %v6540_v37 = vpop.f32.mrb[61].mxu1  ;;  %6548 = vmatprep.mubr.msk.f32.mxu0 %vm358_vm2, %v5221_v36 }
0x2009   :  { %v5294_v38 = vpop.f32.mrb[52].mxu0 }
0x200a   :  { %v6545_v39 = vpop.f32.mrb[53].mxu0  ;;  %6549 = vmatmul.mubr.msk.f32.vlgmr.msra.gmra.mrb[38].mxu0 %vm358_vm2, %v5294_v38 }
0x200b   :  { %6784 = vmatpush3.bf16.msra.mxu0 %v6781_v14 }
0x200c   :  { %6786 = vmatprep.subr.bf16.mxu0 %v6785_v16 }
0x200f   :  { %6788 = vmatpush3.bf16.msra.mxu0 %v6785_v16 }
0x2010   :  { %6790 = vmatprep.subr.bf16.mxu0 %v6789_v20 }
0x2013   :  { %6792 = vmatpush3.bf16.msra.mxu0 %v6789_v20 }
0x20dd   :  { %v6550_v40 = vpop.f32.mrb[38].mxu0 }
0x20de   :  { %v7691_v41 = vadd.f32 %v6550_v40, %v7350_v55  ;;  %v5371_v42 = vpop.f32.mrb[39].mxu0 }
0x20df   :  { %v7694_v43 = vadd.f32 %v5371_v42, %v7355_v58 }
0x20e0   :  { %v5387_v44 = vsel %vm58_vm0, %v7691_v41, 0.0 }
0x20e1   :  { %5388 = vadd.xlane.f32.xlu1 %v5387_v44  ;;  %v5384_v45 = vsel %vm58_vm0, %v7694_v43, 0.0 }
0x20e2   :  { %5385 = vadd.xlane.f32.xlu0 %v5384_v45 }
0x216e   :  { %v5389_v46 = vpop.xlane.xlu1 %5388 }
0x216f   :  { %v5391_v47 = vmul.f32 0.03125, %v5389_v46  ;;  %v5386_v48 = vpop.xlane.xlu0 %5385 }
0x2170   :  { %v5390_v49 = vmul.f32 0.03125, %v5386_v48  ;;  %v5539_v48 = vld [vmem:[%s7776_s12 + $0x38] sm:$0xff] }
0x2171   :  { %v5398_v50 = vrot.slane %v5391_v47, 4 }
0x2172   :  { %v5392_v51 = vrot.slane %v5390_v49, 4 }
0x2173   :  { %v5399_v55 = vadd.f32 %v5398_v50, %v5391_v47  ;;  %v5538_v47 = vld [vmem:[%s7776_s12 + $0x30] sm:$0xff]  ;;  %v5833_v50 = vld [vmem:[%s7775_s11] ss:$0 sm:$0xff]  ;;  %s6920_s12 = smov [#allocation2]  }
0x2174   :  { %v5393_v54 = vadd.f32 %v5392_v51, %v5390_v49  ;;  %v6793_v49 = vpack.c.bf16 %v5539_v48, %v5538_v47  ;;  %s5638_s28 = sshll.u32 %s6920_s12, 4  ;;  %s5639_s28 = int_to_ptr.vmem [resolvable:$true] %s5638_s28 }
0x2175   :  { %v5400_v59 = vrot.slane %v5399_v55, 2  ;;  %s6894_s11 = scalar_lea.vmem %s5639_s28, 256  ;;  %p6899_p1 = scmp.lt.s32.totalorder %s5639_s28, %s5639_s28 }
0x2176   :  { %v5394_v53 = vrot.slane %v5393_v54, 2  ;;  %6794 = vmatprep.subr.bf16.mxu0 %v6793_v49  ;;  %p6895_p0 = scmp.ne.s32.totalorder %s5639_s28, %s6894_s11  ;;  %p6900_p2 = scmp.lt.s32.totalorder %s6894_s11, %s6894_s11 }
0x2177   :  { %v5401_v58 = vadd.f32 %v5400_v59, %v5399_v55  ;;  %6796 = vmatpush3.bf16.msra.mxu0 %v6793_v49 }
0x2178   :  { %v5395_v52 = vadd.f32 %v5394_v53, %v5393_v54  ;;  %p6901_p3 = por %p6900_p2, %p6899_p1 }
0x2179   :  { %v5402_v60 = vrot.slane %v5401_v58, 1 }
0x217a   :  { %v5396_v62 = vrot.slane %v5395_v52, 1  ;;  %p6902_p4 = pnand %p6901_p3, %p6895_p0 }
0x217b   :  { %v5403_v1 = vadd.f32 %v5402_v60, %v5401_v58 }
0x217c   :  { %v5397_v27 = vadd.f32 %v5396_v62, %v5395_v52  ;;  %v5836_v52 = vld [vmem:[%s7777_s13] ss:$0 sm:$0xff] }
0x217d   :  { %v5405_v28 = vmul.f32 0.125, %v5403_v1 }
0x217e   :  { %v5404_v2 = vmul.f32 0.125, %v5397_v27 }
0x217f   :  { %v5407_v0 = vsub.f32 %v7691_v41, %v5405_v28 }
0x2180   :  { %v5406_v6 = vsub.f32 %v7694_v43, %v5404_v2 }
0x2181   :  { %v5409_v3 = vmul.f32 %v5407_v0, %v5407_v0 }
0x2182   :  { %v5408_v61 = vmul.f32 %v5406_v6, %v5406_v6 }
0x2183   :  { %v5413_v4 = vsel %vm58_vm0, %v5409_v3, 0.0 }
0x2184   :  { %5414 = vadd.xlane.f32.xlu1 %v5413_v4  ;;  %v5410_v5 = vsel %vm58_vm0, %v5408_v61, 0.0 }
0x2185   :  { %5411 = vadd.xlane.f32.xlu0 %v5410_v5 }
0x2211   :  { %v5415_v21 = vpop.xlane.xlu1 %5414 }
0x2212   :  { %v5417_v22 = vmul.f32 0.03125, %v5415_v21  ;;  %v5412_v17 = vpop.xlane.xlu0 %5411 }
0x2213   :  { %v5416_v23 = vmul.f32 0.03125, %v5412_v17 }
0x2214   :  { %v5424_v24 = vrot.slane %v5417_v22, 4 }
0x2215   :  { %v5418_v8 = vrot.slane %v5416_v23, 4 }
0x2216   :  { %v5425_v25 = vadd.f32 %v5424_v24, %v5417_v22 }
0x2217   :  { %v5419_v26 = vadd.f32 %v5418_v8, %v5416_v23 }
0x2218   :  { %v5426_v29 = vrot.slane %v5425_v25, 2 }
0x2219   :  { %v5420_v30 = vrot.slane %v5419_v26, 2 }
0x221a   :  { %v5427_v31 = vadd.f32 %v5426_v29, %v5425_v25 }
0x221b   :  { %v5421_v32 = vadd.f32 %v5420_v30, %v5419_v26 }
0x221c   :  { %v5428_v33 = vrot.slane %v5427_v31, 1 }
0x221d   :  { %v5422_v34 = vrot.slane %v5421_v32, 1 }
0x221e   :  { %v5429_v35 = vadd.f32 %v5428_v33, %v5427_v31 }
0x221f   :  { %v5423_v36 = vadd.f32 %v5422_v34, %v5421_v32 }
0x2220   :  { %v5431_v37 = vmul.f32 0.125, %v5429_v35 }
0x2221   :  { %v5430_v38 = vmul.f32 0.125, %v5423_v36 }
0x2222   :  { %v5433_v39 = vadd.f32 1e-05, %v5431_v37 }
0x2223   :  { %v5432_v40 = vadd.f32 1e-05, %v5430_v38 }
0x2224   :  { %6890 = vrsqrt.f32 %v5433_v39 }
0x2225   :  { %6892 = vrsqrt.f32 %v5432_v40 }
0x222e   :  { %v6891_v42 = vpop.eup %6890 }
0x222f   :  { %v6893_v44 = vpop.eup %6892  ;;  %v5437_v46 = vmul.f32 %v6891_v42, %v5407_v0 }
0x2230   :  { %v5436_v45 = vmul.f32 %v6893_v44, %v5406_v6 }
0x2232   :  { %6559 = vmatprep.mubr.msk.f32.mxu1 %vm58_vm0, %v5436_v45 }
0x2233   :  { %6560 = vmatmul.mubr.msk.f32.vlgmr.msra.gmra.mrb[62].mxu1 %vm58_vm0, %v5437_v46 }
0x2306   :  { %v6561_v51 = vpop.f32.mrb[62].mxu1 }
0x2307   :  { %v5527_v55 = vadd.f32 %v6561_v51, %v5833_v50  ;;  %v5521_v54 = vpop.f32.mrb[63].mxu1 }
0x2308   :  { %v5522_v59 = vadd.f32 %v5833_v50, %v5521_v54 }
0x2309   :  { %v5531_v58 = vmax.f32 %v5527_v55, 0.0 }
0x230a   :  { %v5530_v53 = vmax.f32 %v5522_v59, 0.0 }
0x230c   :  { %6578 = vmatprep.mubr.msk.f32.mxu0 %vm5547_vm4, %v5530_v53 }
0x230d   :  { %6579 = vmatmul.mubr.msk.f32.vlgmr.msra.gmra.mrb[54].mxu0 %vm5547_vm4, %v5531_v58 }
0x23e0   :  { %v6580_v60 = vpop.f32.mrb[54].mxu0 }
0x23e1   :  { %v5626_v62 = vadd.f32 %v6580_v60, %v5836_v52  ;;  %v5620_v1 = vpop.f32.mrb[55].mxu0 }
0x23e2   :  { %v5621_v27 = vadd.f32 %v5836_v52, %v5620_v1 }
0x23e3   :  { %v5630_v28 = vadd.f32 %v5626_v62, %v7691_v41 }
0x23e4   :  { %v5629_v2 = vadd.f32 %v5621_v27, %v7694_v43 }
0x23e5   :  { %5632 = vst.msk [vmem:[#allocation2 + $0x8] sm:$0xff] %vm58_vm0, %v5630_v28 }
0x23e6   :  { %5631 = vst.msk [vmem:[#allocation2] sm:$0xff] %vm58_vm0, %v5629_v2 }
0x23e7   :  { %6905 = shalt.err (!%p6902_p4)
}
0x23e8   :  { %s6906_s30 = scalar_lea.hbm %s7778_s14, 256 }
0x23e9   :  { %p6907_p5 = scmp.ne.s32.totalorder %s7778_s14, %s6906_s30  ;;  %p6910_p6 = scmp.lt.u32.totalorder %s6906_s30, %s7778_s14 }
0x23eb   :  { %p6912_p7 = pnand %p6910_p6, %p6907_p5 }
0x23ed   :  { %6915 = shalt.err (!%p6912_p7)
}
0x23ee   :  { %s6921_s17 = smov 128   ;;  %s6922_s18 = smov 8  }
0x23ef   :  { %5644 = dma.vmem_to_hbm [thread:$0]  %s5639_s28, 256, %s7778_s14, [#allocation3], %s6921_s17, %s6921_s17, %s6922_s18  }
0x23f0   :  { %6916 = dma.done.wait [#allocation3], 256  }
0x23f1   :  { %6917 = vsyncadd [#allocation3], 4294967040 }
0x23f2   :  { %5648 = vsyncpa [#allocation3], 1 }

</bundles_post_ra>
